<compile_context>
chip_gen: v5e
topology: v5e:2x2
jax: 0.10.0
libtpu: 0.0.40
codegen_flags: <defaults>
</compile_context>

<pallas_src>
import math
import functools

import jax
import jax.numpy as jnp
from jax import lax
from jax.experimental import pallas as pl
from jax.experimental.pallas import tpu as pltpu


def _gelu_exact(x):
    # F.gelu default (approximate='none'): 0.5 * x * (1 + erf(x / sqrt(2)))
    return 0.5 * x * (1.0 + lax.erf(x * (1.0 / math.sqrt(2.0))))


# ------------------------------- fused MLP kernel -------------------------------
# grid = (M // tm, F4 // tf)
#   axis 0 (parallel) : row tiles of the flattened token dimension
#   axis 1 (arbitrary): tiles of the 4H intermediate / reduction dimension
def mlp_kernel(x_ref, w1_ref, b1_ref, w2_ref, b2_ref, out_ref, acc_ref):
    f = pl.program_id(1)

    @pl.when(f == 0)
    def _():
        acc_ref[...] = jnp.zeros_like(acc_ref)

    # (tm, H) f32 -> bf16 for MXU; f32 accumulation.
    x = x_ref[...].astype(jnp.bfloat16)
    h1 = jnp.dot(x, w1_ref[...], preferred_element_type=jnp.float32)      # (tm, tf)
    h1 = _gelu_exact(h1 + b1_ref[...])                                    # f32 bias + GELU
    acc_ref[...] += jnp.dot(h1.astype(jnp.bfloat16), w2_ref[...],
                            preferred_element_type=jnp.float32)           # (tm, H)

    @pl.when(f == pl.num_programs(1) - 1)
    def _():
        # dropout (eval) is identity; just add the second bias and write out.
        out_ref[...] = (acc_ref[...] + b2_ref[...]).astype(out_ref.dtype)


def gpt_moe_mlp_forward(hidden_states, w1_t, b1, w2_t, b2, *, tm=64, tf=256):
    """hidden_states: (B, S, H) f32
       w1_t: (H, 4H) bf16   b1: (1, 4H) f32
       w2_t: (4H, H) bf16   b2: (1, H)  f32
    """
    B, S, H = hidden_states.shape
    F4 = w1_t.shape[1]
    M = B * S
    assert M % tm == 0 and F4 % tf == 0
    assert H % 128 == 0 and tf % 128 == 0 and tm % 8 == 0

    x2 = hidden_states.reshape(M, H)
    grid = (M // tm, F4 // tf)

    out = pl.pallas_call(
        mlp_kernel,
        out_shape=jax.ShapeDtypeStruct((M, H), jnp.float32),
        grid_spec=pltpu.PrefetchScalarGridSpec(
            num_scalar_prefetch=0,
            grid=grid,
            in_specs=[
                pl.BlockSpec((tm, H), lambda i, f: (i, 0)),   # x rows (resident over f)
                pl.BlockSpec((H, tf), lambda i, f: (0, f)),   # W1 column tile
                pl.BlockSpec((1, tf), lambda i, f: (0, f)),   # b1 tile
                pl.BlockSpec((tf, H), lambda i, f: (f, 0)),   # W2 row tile
                pl.BlockSpec((1, H),  lambda i, f: (0, 0)),   # b2 (constant)
            ],
            out_specs=pl.BlockSpec((tm, H), lambda i, f: (i, 0)),
            scratch_shapes=[pltpu.VMEM((tm, H), jnp.float32)],
        ),
        compiler_params=pltpu.CompilerParams(
            dimension_semantics=("parallel", "arbitrary"),
            vmem_limit_bytes=32 * 1024 * 1024,
        ),
        # TODO(synk): pipeline_mode=pl.Buffered(1) on the constant-index b2 spec would
        # shave a little VMEM; left at default buffering for portability.
    )(x2, w1_t, b1, w2_t, b2)
    return out.reshape(B, S, H)


# --------------------------------- parameter setup --------------------------------

def init_params(key, hidden):
    k1, k2 = jax.random.split(key)
    # nn.Linear weight is (out, in); pre-transpose to (in, out) and store bf16 in HBM.
    w1 = (jax.random.normal(k1, (4 * hidden, hidden), jnp.float32) * 0.02)
    w2 = (jax.random.normal(k2, (hidden, 4 * hidden), jnp.float32) * 0.02)
    return {
        "w1_t": w1.T.astype(jnp.bfloat16),              # (H, 4H)
        "b1": jnp.zeros((1, 4 * hidden), jnp.float32),
        "w2_t": w2.T.astype(jnp.bfloat16),              # (4H, H)
        "b2": jnp.zeros((1, hidden), jnp.float32),
    }


def reference_mlp(hidden_states, params):
    # Pure-JAX reference (f32 math on the same bf16-stored weights).
    w1 = params["w1_t"].astype(jnp.float32)
    w2 = params["w2_t"].astype(jnp.float32)
    h1 = _gelu_exact(hidden_states @ w1 + params["b1"][0])
    return h1 @ w2 + params["b2"][0]


# -------------------------------------- main --------------------------------------

if __name__ == "__main__":
    # Shapes chosen lane-dense: H and 4H multiples of 128, rows a multiple of the tile.
    BATCH, SEQ, HIDDEN = 2, 64, 128

    key = jax.random.PRNGKey(0)
    pkey, xkey = jax.random.split(key)
    params = init_params(pkey, HIDDEN)
    hidden_states = jax.random.normal(xkey, (BATCH, SEQ, HIDDEN), jnp.float32)

    out = gpt_moe_mlp_forward(hidden_states, params["w1_t"], params["b1"],
                              params["w2_t"], params["b2"], tm=64, tf=256)
    out = jax.block_until_ready(out)

    assert out.shape == (BATCH, SEQ, HIDDEN)
    assert bool(jnp.all(jnp.isfinite(out)))

    ref = reference_mlp(hidden_states, params)
    assert bool(jnp.allclose(out, ref, atol=3e-2, rtol=3e-2)), "mismatch vs reference"

    print("KERNEL_OK")
</pallas_src>

<mosaic_0001>
module attributes {stable_mosaic.version = 11 : i64} {
  func.func @mlp_kernel(%arg0: i32, %arg1: i32, %arg2: memref<64x128xf32, #tpu.memory_space<vmem>>, %arg3: memref<128x256xbf16, #tpu.memory_space<vmem>>, %arg4: memref<1x256xf32, #tpu.memory_space<vmem>>, %arg5: memref<256x128xbf16, #tpu.memory_space<vmem>>, %arg6: memref<1x128xf32, #tpu.memory_space<vmem>>, %arg7: memref<64x128xf32, #tpu.memory_space<vmem>>, %arg8: memref<64x128xf32, #tpu.memory_space<vmem>>) attributes {dimension_semantics = [#tpu.dimension_semantics<parallel>, #tpu.dimension_semantics<arbitrary>], iteration_bounds = array<i64: 2, 2>, scalar_prefetch = 0 : i64, scratch_operands = 1 : i64, tpu.core_type = #tpu.core_type<tc>, window_params = [{transform_indices = @transform_0, window_bounds = array<i64: 64, 128>}, {transform_indices = @transform_1, window_bounds = array<i64: 128, 256>}, {transform_indices = @transform_2, window_bounds = array<i64: 1, 256>}, {transform_indices = @transform_3, window_bounds = array<i64: 256, 128>}, {pipeline_mode = #tpu.pipeline_mode<synchronous>, transform_indices = @transform_4, window_bounds = array<i64: 1, 128>}, {transform_indices = @transform_5, window_bounds = array<i64: 64, 128>}]} {
    %c0_i32 = arith.constant 0 : i32
    %0 = arith.cmpi eq, %arg1, %c0_i32 : i32
    %1 = arith.extui %0 : i1 to i32
    %c0_i32_0 = arith.constant 0 : i32
    %2 = arith.cmpi ne, %1, %c0_i32_0 : i32
    scf.if %2 {
      %cst_17 = arith.constant 0.000000e+00 : f32
      %27 = vector.broadcast %cst_17 : f32 to vector<64x128xf32>
      %c0_18 = arith.constant 0 : index
      %c0_19 = arith.constant 0 : index
      %28 = vector.load %arg8[%c0_18, %c0_19] : memref<64x128xf32, #tpu.memory_space<vmem>>, vector<64x128xf32>
      tpu.vector_store %arg8[%c0_18, %c0_19], %27 {strides = array<i32>} : memref<64x128xf32, #tpu.memory_space<vmem>>, vector<64x128xf32>,
    } else {
    }
    %c0 = arith.constant 0 : index
    %c0_1 = arith.constant 0 : index
    %3 = vector.load %arg2[%c0, %c0_1] : memref<64x128xf32, #tpu.memory_space<vmem>>, vector<64x128xf32>
    %4 = arith.truncf %3 : vector<64x128xf32> to vector<64x128xbf16>
    %c0_2 = arith.constant 0 : index
    %c0_3 = arith.constant 0 : index
    %5 = vector.load %arg3[%c0_2, %c0_3] : memref<128x256xbf16, #tpu.memory_space<vmem>>, vector<128x256xbf16>
    %cst = arith.constant dense<0.000000e+00> : vector<64x256xf32>
    %6 = tpu.matmul %4, %5, %cst {dimension_numbers = #tpu.dot_dimension_numbers<[1], [0], [0], [1], [0, 0, 1, 1], [], []>} : vector<64x128xbf16>, vector<128x256xbf16>, vector<64x256xf32> -> vector<64x256xf32>
    %c0_4 = arith.constant 0 : index
    %c0_5 = arith.constant 0 : index
    %7 = vector.load %arg4[%c0_4, %c0_5] : memref<1x256xf32, #tpu.memory_space<vmem>>, vector<1x256xf32>
    %8 = vector.broadcast %7 : vector<1x256xf32> to vector<64x256xf32>
    %9 = arith.addf %6, %8 : vector<64x256xf32>
    %cst_6 = arith.constant 5.000000e-01 : f32
    %10 = vector.broadcast %cst_6 : f32 to vector<64x256xf32>
    %11 = arith.mulf %10, %9 : vector<64x256xf32>
    %cst_7 = arith.constant 0.707106769 : f32
    %12 = vector.broadcast %cst_7 : f32 to vector<64x256xf32>
    %13 = arith.mulf %9, %12 : vector<64x256xf32>
    %14 = math.erf %13 : vector<64x256xf32>
    %cst_8 = arith.constant 1.000000e+00 : f32
    %15 = vector.broadcast %cst_8 : f32 to vector<64x256xf32>
    %16 = arith.addf %15, %14 : vector<64x256xf32>
    %17 = arith.mulf %11, %16 : vector<64x256xf32>
    %c0_9 = arith.constant 0 : index
    %c0_10 = arith.constant 0 : index
    %18 = vector.load %arg8[%c0_9, %c0_10] : memref<64x128xf32, #tpu.memory_space<vmem>>, vector<64x128xf32>
    %19 = arith.truncf %17 : vector<64x256xf32> to vector<64x256xbf16>
    %c0_11 = arith.constant 0 : index
    %c0_12 = arith.constant 0 : index
    %20 = vector.load %arg5[%c0_11, %c0_12] : memref<256x128xbf16, #tpu.memory_space<vmem>>, vector<256x128xbf16>
    %cst_13 = arith.constant dense<0.000000e+00> : vector<64x128xf32>
    %21 = tpu.matmul %19, %20, %cst_13 {dimension_numbers = #tpu.dot_dimension_numbers<[1], [0], [0], [1], [0, 0, 1, 1], [], []>} : vector<64x256xbf16>, vector<256x128xbf16>, vector<64x128xf32> -> vector<64x128xf32>
    %22 = arith.addf %18, %21 : vector<64x128xf32>
    %c0_14 = arith.constant 0 : index
    %c0_15 = arith.constant 0 : index
    %23 = vector.load %arg8[%c0_14, %c0_15] : memref<64x128xf32, #tpu.memory_space<vmem>>, vector<64x128xf32>
    tpu.vector_store %arg8[%c0_14, %c0_15], %22 {strides = array<i32>} : memref<64x128xf32, #tpu.memory_space<vmem>>, vector<64x128xf32>,
    %c1_i32 = arith.constant 1 : i32
    %24 = arith.cmpi eq, %arg1, %c1_i32 : i32
    %25 = arith.extui %24 : i1 to i32
    %c0_i32_16 = arith.constant 0 : i32
    %26 = arith.cmpi ne, %25, %c0_i32_16 : i32
    scf.if %26 {
      %c0_17 = arith.constant 0 : index
      %c0_18 = arith.constant 0 : index
      %27 = vector.load %arg8[%c0_17, %c0_18] : memref<64x128xf32, #tpu.memory_space<vmem>>, vector<64x128xf32>
      %c0_19 = arith.constant 0 : index
      %c0_20 = arith.constant 0 : index
      %28 = vector.load %arg6[%c0_19, %c0_20] : memref<1x128xf32, #tpu.memory_space<vmem>>, vector<1x128xf32>
      %29 = vector.broadcast %28 : vector<1x128xf32> to vector<64x128xf32>
      %30 = arith.addf %27, %29 : vector<64x128xf32>
      %c0_21 = arith.constant 0 : index
      %c0_22 = arith.constant 0 : index
      %31 = vector.load %arg7[%c0_21, %c0_22] : memref<64x128xf32, #tpu.memory_space<vmem>>, vector<64x128xf32>
      tpu.vector_store %arg7[%c0_21, %c0_22], %30 {strides = array<i32>} : memref<64x128xf32, #tpu.memory_space<vmem>>, vector<64x128xf32>,
    } else {
    }
    return
  }
  func.func @transform_0(%arg0: i32, %arg1: i32) -> (i32, i32) {
    %c0_i32 = arith.constant 0 : i32
    %c0_i32_0 = arith.constant 0 : i32
    return %arg0, %c0_i32 : i32, i32
  }
  func.func @transform_1(%arg0: i32, %arg1: i32) -> (i32, i32) {
    %c0_i32 = arith.constant 0 : i32
    %c0_i32_0 = arith.constant 0 : i32
    return %c0_i32, %arg1 : i32, i32
  }
  func.func @transform_2(%arg0: i32, %arg1: i32) -> (i32, i32) {
    %c0_i32 = arith.constant 0 : i32
    %c0_i32_0 = arith.constant 0 : i32
    return %c0_i32, %arg1 : i32, i32
  }
  func.func @transform_3(%arg0: i32, %arg1: i32) -> (i32, i32) {
    %c0_i32 = arith.constant 0 : i32
    %c0_i32_0 = arith.constant 0 : i32
    return %arg1, %c0_i32 : i32, i32
  }
  func.func @transform_4(%arg0: i32, %arg1: i32) -> (i32, i32) {
    %c0_i32 = arith.constant 0 : i32
    %c0_i32_0 = arith.constant 0 : i32
    %c0_i32_1 = arith.constant 0 : i32
    return %c0_i32, %c0_i32_0 : i32, i32
  }
  func.func @transform_5(%arg0: i32, %arg1: i32) -> (i32, i32) {
    %c0_i32 = arith.constant 0 : i32
    %c0_i32_0 = arith.constant 0 : i32
    return %arg0, %c0_i32 : i32, i32
  }
}

</mosaic_0001>

<bundles_post_ra>
// kernel: tpu_custom_call.1
= control target key start
LH: loop header
LB: loop body
LE: loop exit
PB: predicated region body
PF: predicated region fallthrough
CT: control target
= control target key end

     0   :  { %s3343_s0 = inlined_call_operand.hbm [shape: f32[128,128], index: 0, kind: input, shape index: {}]   ;;  %s3344_s1 = inlined_call_operand.hbm [shape: bf16[128,512], index: 1, kind: input, shape index: {}]   ;;  %s3345_s2 = inlined_call_operand.hbm [shape: f32[1,512], index: 2, kind: input, shape index: {}]   ;;  %s3346_s3 = inlined_call_operand.hbm [shape: bf16[512,128], index: 3, kind: input, shape index: {}]   ;;  %s3347_s4 = inlined_call_operand.vmem [shape: f32[1,128], index: 4, kind: input, shape index: {}]   ;;  %s3348_s5 = inlined_call_operand.hbm [shape: f32[128,128], index: 5, kind: output, shape index: {}]  }
   0x1   :  { %3372 = sst [smem:[#allocation41_spill]] %s3343_s0 }
   0x2   :  { %3373 = sst [smem:[#allocation42_spill]] %s3344_s1 }
   0x3   :  { %3374 = sst [smem:[#allocation43_spill]] %s3347_s4 }
   0x4   :  { %3375 = sst [smem:[#allocation44_spill]] %s3348_s5 }
   0x5   :  { %10 = vsyncpa [#allocation4], 0 }
   0x6   :  { %12 = vsyncpa [#allocation4 + $0x1], 0 }
   0x7   :  { %13 = vsyncpa [#allocation7], 0 }
   0x8   :  { %15 = vsyncpa [#allocation7 + $0x1], 0 }
   0x9   :  { %16 = vsyncpa [#allocation10], 0 }
   0xa   :  { %18 = vsyncpa [#allocation10 + $0x1], 0 }
   0xb   :  { %19 = vsyncpa [#allocation5], 0 }
   0xc   :  { %21 = vsyncpa [#allocation5 + $0x1], 0  ;;  %s2342_s18 = smov 0   ;;  %s2344_s19 = smov 0  }
   0xd   :  { %s2346_s20 = smov 0   ;;  %s2348_s21 = smov 0  }
   0xe   :  { %s2350_s22 = smov 0   ;;  %s2352_s23 = smov 0  }
   0xf   :  { %s2354_s24 = smov 0   ;;  %s2356_s25 = smov 0  }
  0x10   :  { %s2358_s26 = smov 0   ;;  %s2360_s27 = smov 0  }
  0x11   :  { %s2362_s28 = smov 0  }
  0x12 LB: > { %3376 = sst [smem:[#allocation16_spill]] %s2270_s20  ;;  %p54_p0 = scmp.eq.s32.totalorder %s2302_s28, 0  ;;  %s2302_s28 = sphi %s2362_s28, %s27_s28   ;;  %s2298_s27 = sphi %s2360_s27, %s3463_s27   ;;  %s2294_s26 = sphi %s2358_s26, %s3469_s26   ;;  %s2290_s25 = sphi %s2356_s25, %s3461_s25   ;;  %s2286_s24 = sphi %s2354_s24, %s3468_s24   ;;  %s2282_s23 = sphi %s2352_s23, %s3460_s23   ;;  %s2278_s22 = sphi %s2350_s22, %s3467_s22   ;;  %s2274_s21 = sphi %s2348_s21, %s3466_s21   ;;  %s2270_s20 = sphi %s2346_s20, %s3458_s20   ;;  %s2266_s19 = sphi %s2344_s19, %s3465_s19   ;;  %s2262_s18 = sphi %s2342_s18, %s3464_s18  }
  0x13   : > { %3377 = sst [smem:[#allocation17_spill]] %s2274_s21  ;;  %p79_p1 = scmp.ne.s32.totalorder %s2270_s20, %s2266_s19 }
  0x14   : > { %3378 = sst [smem:[#allocation18_spill]] %s2282_s23  ;;  %p85_p2 = scmp.ne.s32.totalorder %s2266_s19, %s2262_s18 }
  0x15   : > { %3379 = sst [smem:[#allocation19_spill]] %s2286_s24  ;;  %p3353_p3 = scmp.lt.s32.totalorder %s2302_s28, 4 }
  0x16   : > { %3380 = sst [smem:[#allocation20_spill]] %s2290_s25  ;;  %p81_p4 = por %p79_p1, %p54_p0 }
  0x17   : > { %3381 = sst [smem:[#allocation21_spill]] %s2298_s27  ;;  %s233_s30 = sand.u32 1, %s2302_s28  }
  0x18   : > { %3382 = sst [smem:[#allocation22_spill]] %s2302_s28  ;;  %s2408_s6 = sand.u32 1, %s2270_s20  }
  0x19   : > { %s3349_s7 = sshll.u32 %s2408_s6, 7  ;;  %s1859_s8 = sshll.u32 %s2294_s26, 3 }
  0x1a   : > { %s3383_s1 = sld [smem:[#allocation42_spill]]  ;;  %s237_s13 = scalar_lea.vmem [#allocation6], %s3349_s7 }
  0x1b   : > { %s245_s14 = sshll.u32 %s237_s13, 4  ;;  %p2419_p5 = pnand %p3353_p3, %p81_p4  ;;  %s246_s14 = int_to_ptr.vmem [resolvable:$true] %s245_s14 }
  0x1c   : > { %p1701_p6 = scmp.ge.s32.totalorder %s2302_s28, 1  ;;  %p294_p7 = scmp.lt.s32.totalorder %s2302_s28, 5 }
  0x1d   : > { %s2425_s16 = scalar_lea.sflag [#allocation7], %s233_s30  ;;  %s2304_s17 = smov 256  }
  0x1e   : > { %s3351_s9 = smov 8   ;;  %p2432_p8 = pnand %p1701_p6, %p294_p7 }
  0x1f   : > { %s2437_s30 = sadd.s32 4294967295, %s2302_s28   ;;  %s36_s13 = sadd.s32 1, %s2294_s26 }
  0x20   : > { %s242_s11 = scalar_lea.hbm %s3383_s1, %s1859_s8  ;;  %s3350_s8 = smov 128  }
  0x21   : > { %s243_s12 = sshll.u32 %s242_s11, 4  ;;  %s1687_s11 = sadd.s32 4294967294, %s2302_s28   ;;  %s244_s12 = int_to_ptr.hbm [resolvable:$true] %s243_s12 }
  0x22   : > { %1910 = dma.hbm_to_vmem [thread:$0]  (!%p2419_p5), %s244_s12, 2048, %s246_s14, %s2425_s16, %s2304_s17, %s3350_s8, %s3351_s9  }
  0x23   : > { %s39_s7 = sadd.s32 1, %s2298_s27  ;;  %p37_p9 = scmp.ge.s32.totalorder %s36_s13, 2 }
  0x24   : > { %s46_s29 = sadd.s32 1, %s2282_s23  ;;  %p53_p10 = scmp.ne.s32.totalorder %s2282_s23, %s2278_s22 }
  0x25   : > { %p59_p11 = scmp.ne.s32.totalorder %s2278_s22, %s2274_s21  ;;  %s3471_s13 = smov (%p37_p9, %s36_s13), 0 }
  0x26   : > { %3386 = sst [smem:[#allocation23_spill]] %s3471_s13  ;;  %s3473_s7 = smov (!%p37_p9, %s39_s7), %s2298_s27 }
  0x27   : > { %p2455_p12 = por %p54_p0, %p53_p10  ;;  %p60_p13 = scmp.eq.s32.totalorder %s2437_s30, 0 }
  0x28   : > { %p41_p1 = scmp.ge.s32.totalorder %s3473_s7, 2  ;;  %s69_s14 = ssub.s32 %s2294_s26, %s3471_s13 }
  0x29   : > { %p2465_p4 = por %p60_p13, %p59_p11  ;;  %p70_p6 = scmp.eq.s32.totalorder %s69_s14, 0 }
  0x2a   : > { %s3475_s7 = smov (%p41_p1, %s3473_s7), 0  ;;  %s3390_s8 = sadd.s32 1, %s2270_s20 }
  0x2b   : > { %3389 = sst [smem:[#allocation24_spill]] %s3475_s7  ;;  %s43_s1 = ssub.s32 %s2298_s27, %s3475_s7 }
  0x2c   : > { %s2474_s9 = scalar_select %p70_p6, %s2270_s20, %s3390_s8  }
  0x2d   : > { %p2481_p0 = por %p85_p2, %p60_p13  ;;  %p44_p7 = scmp.eq.s32.totalorder %s43_s1, 0 }
  0x2e   : > { %3391 = sst [smem:[#allocation25_spill]] %s2474_s9  ;;  %p182_p9 = scmp.eq.s32.totalorder %s2437_s30, 3 }
  0x2f   : > { %p188_p3 = scmp.eq.s32.totalorder %s1687_s11, 3  ;;  %s211_s14 = sand.u32 1, %s2282_s23  }
  0x30   : > { %s2488_s13 = scalar_select %p44_p7, %s2282_s23, %s46_s29  }
  0x31   : > { %p2493_p1 = por %p182_p9, %p53_p10  ;;  %p2500_p2 = por %p188_p3, %p59_p11 }
  0x32   : > { %3393 = sst [smem:[#allocation26_spill]] %s2488_s13  ;;  %s1690_s7 = sshll.u32 %s211_s14, 6 }
  0x33   : > { %s3394_s8 = scalar_select %p2493_p1, 1, 0 }
  0x34   : > { %s3396_s18 = scalar_select %p2500_p2, 1, 0 }
  0x35   : > { %3395 = sst [smem:[#allocation27_spill]] %s3394_s8  ;;  %s1858_s9 = sshll.u32 %s2298_s27, 6 }
  0x36   : > { %3397 = sst [smem:[#allocation28_spill]] %s3396_s18  ;;  %s215_s11 = scalar_lea.vmem [#allocation3], %s1690_s7 }
  0x37   : > { %s3398_s0 = sld [smem:[#allocation41_spill]]  ;;  %s223_s29 = sshll.u32 %s215_s11, 4  ;;  %s224_s29 = int_to_ptr.vmem [resolvable:$true] %s223_s29 }
  0x38   : > { %p3399_p3 = scmp.lt.s32.totalorder %s2302_s28, 4  ;;  %s1696_s23 = sshll.u32 %s2408_s6, 1 }
  0x39   : > { %s1697_s18 = sshll.u32 %s2294_s26, 1  ;;  %s212_s21 = scalar_lea.sflag [#allocation4], %s211_s14 }
  0x3a   : > { %p1905_p10 = pnand %p3399_p3, %p2455_p12  ;;  %s3400_s27 = smov 8  }
  0x3b   : > { %s3401_s8 = smov 128   ;;  %s259_s1 = scalar_lea.vmem [#allocation8], %s1696_s23 }
  0x3c   : > { %s1860_s12 = sshll.u32 %s2294_s26, 7  ;;  %s3402_s4 = sshll.u32 %s2408_s6, 7 }
  0x3d   : > { %s220_s25 = scalar_lea.hbm %s3398_s0, %s1858_s9  ;;  %s263_s9 = scalar_lea.hbm %s3345_s2, %s1697_s18 }
  0x3e   : > { %s221_s13 = sshll.u32 %s220_s25, 4  ;;  %s267_s25 = sshll.u32 %s259_s1, 4  ;;  %s222_s13 = int_to_ptr.hbm [resolvable:$true] %s221_s13  ;;  %s268_s25 = int_to_ptr.vmem [resolvable:$true] %s267_s25 }
  0x3f   : > { %1907 = dma.hbm_to_vmem [thread:$0]  (!%p1905_p10), %s222_s13, 1024, %s224_s29, %s212_s21, %s3401_s8, %s3401_s8, %s3400_s27  }
  0x40   : > { %s265_s11 = sshll.u32 %s263_s9, 4  ;;  %s283_s28 = scalar_lea.hbm %s3346_s3, %s1860_s12  ;;  %s266_s11 = int_to_ptr.hbm [resolvable:$true] %s265_s11 }
  0x41   : > { %1913 = dma.hbm_to_vmem [thread:$0]  (!%p2419_p5), %s266_s11, 32, %s268_s25, %s2425_s16  }
  0x42   : > { %s278_s24 = scalar_lea.vmem [#allocation9], %s3402_s4  ;;  %s284_s27 = sshll.u32 %s283_s28, 4  ;;  %s285_s27 = int_to_ptr.hbm [resolvable:$true] %s284_s27 }
  0x43   : > { %s286_s21 = sshll.u32 %s278_s24, 4  ;;  %s275_s13 = scalar_lea.sflag [#allocation10], %s2408_s6  ;;  %s287_s21 = int_to_ptr.vmem [resolvable:$true] %s286_s21 }
  0x44   : > { %s2307_s23 = smov 64   ;;  %s2308_s8 = smov 4  }
  0x45   : > { %1916 = dma.hbm_to_vmem [thread:$0]  (!%p2419_p5), %s285_s27, 2048, %s287_s21, %s275_s13, %s2307_s23, %s2307_s23, %s2308_s8  }
  0x46   : > { %298 = sbr.rel (%p2432_p8) target bundleno = 652 (0x28c), region = 40 }
  0x4b   : > { %s2535_s16 = sand.u32 1, %s2278_s22  }
  0x4c   : > { %s1702_s0 = sshll.u32 %s2535_s16, 6  ;;  %s301_s4 = scalar_lea.sflag [#allocation4], %s2535_s16 }
  0x4d   : > { %s2539_s24 = scalar_lea.vmem [#allocation3], %s1702_s0 }
  0x4e   : > { %2245 = dma.done.wait (%p2465_p4), %s301_s4, 1024  }
  0x4f   : > { %2247 = vsyncadd (%p2465_p4), %s301_s4, 4294966272  ;;  %s310_s28 = sand.u32 1, %s2437_s30   ;;  %s312_s6 = sand.u32 1, %s2266_s19  }
  0x50   : > { %s1703_s15 = sshll.u32 %s312_s6, 7  ;;  %s311_s10 = scalar_lea.sflag [#allocation7], %s310_s28 }
  0x51   : > { %s2547_s18 = scalar_lea.vmem [#allocation6], %s1703_s15 }
  0x52   : > { %2249 = dma.done.wait (%p2481_p0), %s311_s10, 2080  }
  0x53   : > { %2251 = vsyncadd (%p2481_p0), %s311_s10, 4294965216  ;;  %s1704_s29 = sshll.u32 %s312_s6, 1  ;;  %s331_s17 = scalar_lea.sflag [#allocation10], %s312_s6 }
  0x54   : > { %s2553_s20 = scalar_lea.vmem [#allocation8], %s1704_s29  ;;  %s2555_s7 = scalar_lea.vmem [#allocation9], %s1703_s15 }
  0x55   : > { %2253 = dma.done.wait (%p2481_p0), %s331_s17, 2048  }
  0x56   : > { %2255 = vsyncadd (%p2481_p0), %s331_s17, 4294965248  ;;  %s2561_s30 = scalar_lea.vmem [#allocation11], %s1702_s0  ;;  %s3403_s9 = sld [smem:[#allocation19_spill]] }
  0x5c   : > { %p1707_p5 = scmp.ne.s32.totalorder %s3403_s9, 0 }
  0x5e   : > { %385 = sbr.rel (%p1707_p5) target bundleno = 108 (0x6c), region = 60 }
  0x63   : > { %v2309_v0 = vmov 0.0  }
  0x64   : > { %386 = vst [vmem:[#allocation2 + $0x30] sm:$0xff] %v2309_v0 }
  0x65   : > { %387 = vst [vmem:[#allocation2] sm:$0xff] %v2309_v0 }
  0x66   : > { %388 = vst [vmem:[#allocation2 + $0x18] sm:$0xff] %v2309_v0 }
  0x67   : > { %389 = vst [vmem:[#allocation2 + $0x10] sm:$0xff] %v2309_v0 }
  0x68   : > { %390 = vst [vmem:[#allocation2 + $0x8] sm:$0xff] %v2309_v0 }
  0x69   : > { %391 = vst [vmem:[#allocation2 + $0x20] sm:$0xff] %v2309_v0 }
  0x6a   : > { %392 = vst [vmem:[#allocation2 + $0x28] sm:$0xff] %v2309_v0 }
  0x6b   : > { %393 = vst [vmem:[#allocation2 + $0x38] sm:$0xff] %v2309_v0 }
  0x6c PF: > { %v1766_v1 = vld [vmem:[%s2547_s18 + $0x70] sm:$0xf]  ;;  %v1876_v2 = vld [vmem:[%s2547_s18 + $0x74] sm:$0xf0]  ;;  %v1875_v3 = vld [vmem:[%s2547_s18 + $0x74] sm:$0xf] }
  0x6d   : > { %v1767_v4 = vor.u32 %v1876_v2, %v1766_v1  ;;  %v1768_v5 = vld [vmem:[%s2547_s18 + $0x78] sm:$0xf0]  ;;  %v1758_v6 = vld [vmem:[%s2547_s18 + $0x60] sm:$0xf]  ;;  %v1874_v7 = vld [vmem:[%s2547_s18 + $0x64] sm:$0xf0] }
  0x6e   : > { %v1771_v8 = vor.u32 %v1875_v3, %v1768_v5  ;;  %v1873_v9 = vld [vmem:[%s2547_s18 + $0x64] sm:$0xf]  ;;  %v1760_v10 = vld [vmem:[%s2547_s18 + $0x68] sm:$0xf0]  ;;  %v1759_v11 = vor.u32 %v1874_v7, %v1758_v6  ;;  %v1750_v13 = vld [vmem:[%s2547_s18 + $0x50] sm:$0xf] }
  0x6f   : > { %508 = vmatpush.bf16.msra.mxu0 %v1767_v4  ;;  %v1763_v12 = vor.u32 %v1873_v9, %v1760_v10  ;;  %v1872_v14 = vld [vmem:[%s2547_s18 + $0x54] sm:$0xf0]  ;;  %v1871_v15 = vld [vmem:[%s2547_s18 + $0x54] sm:$0xf]  ;;  %v1752_v16 = vld [vmem:[%s2547_s18 + $0x58] sm:$0xf0] }
  0x70   : > { %537 = vmatpush.bf16.msra.mxu1 %v1771_v8  ;;  %v1751_v17 = vor.u32 %v1872_v14, %v1750_v13  ;;  %v1755_v18 = vor.u32 %v1871_v15, %v1752_v16  ;;  %v1742_v19 = vld [vmem:[%s2547_s18 + $0x40] sm:$0xf]  ;;  %v1870_v20 = vld [vmem:[%s2547_s18 + $0x44] sm:$0xf0]  ;;  %v1869_v21 = vld [vmem:[%s2547_s18 + $0x44] sm:$0xf] }
  0x71   : > { %v1744_v22 = vld [vmem:[%s2547_s18 + $0x48] sm:$0xf0]  ;;  %v1743_v23 = vor.u32 %v1870_v20, %v1742_v19  ;;  %v1734_v25 = vld [vmem:[%s2547_s18 + $0x30] sm:$0xf]  ;;  %v1868_v26 = vld [vmem:[%s2547_s18 + $0x34] sm:$0xf0] }
  0x72   : > { %v1747_v24 = vor.u32 %v1869_v21, %v1744_v22  ;;  %v1867_v27 = vld [vmem:[%s2547_s18 + $0x34] sm:$0xf]  ;;  %v1736_v28 = vld [vmem:[%s2547_s18 + $0x38] sm:$0xf0]  ;;  %v1735_v29 = vor.u32 %v1868_v26, %v1734_v25  ;;  %v1726_v31 = vld [vmem:[%s2547_s18 + $0x20] sm:$0xf] }
  0x73   : > { %509 = vmatpush.bf16.msra.mxu0 %v1759_v11  ;;  %v1739_v30 = vor.u32 %v1867_v27, %v1736_v28  ;;  %v1866_v32 = vld [vmem:[%s2547_s18 + $0x24] sm:$0xf0]  ;;  %v1865_v33 = vld [vmem:[%s2547_s18 + $0x24] sm:$0xf]  ;;  %v1728_v34 = vld [vmem:[%s2547_s18 + $0x28] sm:$0xf0] }
  0x74   : > { %538 = vmatpush.bf16.msra.mxu1 %v1763_v12  ;;  %v1727_v35 = vor.u32 %v1866_v32, %v1726_v31  ;;  %v1731_v36 = vor.u32 %v1865_v33, %v1728_v34  ;;  %v1718_v37 = vld [vmem:[%s2547_s18 + $0x10] sm:$0xf]  ;;  %v1864_v38 = vld [vmem:[%s2547_s18 + $0x14] sm:$0xf0]  ;;  %v1863_v39 = vld [vmem:[%s2547_s18 + $0x14] sm:$0xf] }
  0x75   : > { %v1720_v40 = vld [vmem:[%s2547_s18 + $0x18] sm:$0xf0]  ;;  %v1719_v41 = vor.u32 %v1864_v38, %v1718_v37  ;;  %v1710_v43 = vld [vmem:[%s2547_s18] sm:$0xf]  ;;  %v1862_v44 = vld [vmem:[%s2547_s18 + $0x4] sm:$0xf0] }
  0x76   : > { %v1723_v42 = vor.u32 %v1863_v39, %v1720_v40  ;;  %v1861_v45 = vld [vmem:[%s2547_s18 + $0x4] sm:$0xf]  ;;  %v1712_v46 = vld [vmem:[%s2547_s18 + $0x8] sm:$0xf0]  ;;  %v1711_v47 = vor.u32 %v1862_v44, %v1710_v43  ;;  %v396_v52 = vld [vmem:[%s2539_s24 + $0x10] sm:$0xff]  ;;  %s3448_s5 = sld [smem:[#allocation19_spill]] }
  0x77   : > { %510 = vmatpush.bf16.msra.mxu0 %v1751_v17  ;;  %v394_v48 = vld [vmem:[%s2539_s24] sm:$0xff]  ;;  %v395_v49 = vld [vmem:[%s2539_s24 + $0x8] sm:$0xff]  ;;  %v1715_v50 = vor.u32 %v1861_v45, %v1712_v46  ;;  %v397_v53 = vld [vmem:[%s2539_s24 + $0x18] sm:$0xff] }
  0x78   : > { %539 = vmatpush.bf16.msra.mxu1 %v1755_v18  ;;  %v402_v51 = vpack.c.bf16 %v395_v49, %v394_v48  ;;  %v403_v54 = vpack.c.bf16 %v397_v53, %v396_v52  ;;  %v398_v55 = vld [vmem:[%s2539_s24 + $0x20] sm:$0xff]  ;;  %v399_v56 = vld [vmem:[%s2539_s24 + $0x28] sm:$0xff]  ;;  %v400_v58 = vld [vmem:[%s2539_s24 + $0x30] sm:$0xff] }
  0x79   : > { %v404_v57 = vpack.c.bf16 %v399_v56, %v398_v55  ;;  %v401_v59 = vld [vmem:[%s2539_s24 + $0x38] sm:$0xff]  ;;  %v422_v61 = vld [vmem:[%s2553_s20] sm:$0x3]  ;;  %v1882_v20 = vld [vmem:[%s2555_s7 + $0x28] sm:$0xff] }
  0x7a   : > { %v405_v60 = vpack.c.bf16 %v401_v59, %v400_v58  ;;  %v2605_v62 = vperm.slane %v422_v61, 0  ;;  %v2607_v63 = vperm.slane %v422_v61, 1  ;;  %v1884_v5 = vld [vmem:[%s2555_s7 + $0x38] sm:$0xff]  ;;  %v1883_v10 = vld [vmem:[%s2555_s7 + $0x30] sm:$0xff]  ;;  %v1881_v28 = vld [vmem:[%s2555_s7 + $0x20] sm:$0xff] }
  0x7b   : > { %511 = vmatpush.bf16.msra.mxu0 %v1743_v23  ;;  %v1892_v6 = vld [vmem:[%s2555_s7 + $0x78] sm:$0xff]  ;;  %1414 = vmatpush.bf16.msra.mxu2 %v1884_v5  ;;  %v1891_v11 = vld [vmem:[%s2555_s7 + $0x70] sm:$0xff] }
  0x7c   : > { %540 = vmatpush.bf16.msra.mxu1 %v1747_v24  ;;  %1443 = vmatpush.bf16.msra.mxu3 %v1892_v6  ;;  %v1890_v24 = vld [vmem:[%s2555_s7 + $0x68] sm:$0xff]  ;;  %v1880_v43 = vld [vmem:[%s2555_s7 + $0x18] sm:$0xff]  ;;  %p1852_p8 = scmp.ne.s32.totalorder %s3448_s5, 1 }
  0x7d   : > { %v1888_v44 = vld [vmem:[%s2555_s7 + $0x58] sm:$0xff]  ;;  %s3449_s11 = sld [smem:[#allocation43_spill]] (!%p1852_p8) }
  0x7f   : > { %512 = vmatpush.bf16.msra.mxu0 %v1735_v29  ;;  %1415 = vmatpush.bf16.msra.mxu2 %v1883_v10  ;;  %v1889_v29 = vld [vmem:[%s2555_s7 + $0x60] sm:$0xff]  ;;  %v1886_v10 = vld [vmem:[%s2555_s7 + $0x48] sm:$0xff] }
  0x80   : > { %541 = vmatpush.bf16.msra.mxu1 %v1739_v30  ;;  %1444 = vmatpush.bf16.msra.mxu3 %v1891_v11 }
  0x83   : > { %513 = vmatpush.bf16.msra.mxu0 %v1727_v35  ;;  %1416 = vmatpush.bf16.msra.mxu2 %v1882_v20 }
  0x84   : > { %542 = vmatpush.bf16.msra.mxu1 %v1731_v36  ;;  %1445 = vmatpush.bf16.msra.mxu3 %v1890_v24 }
  0x87   : > { %514 = vmatpush.bf16.msra.mxu0 %v1719_v41  ;;  %1417 = vmatpush.bf16.msra.mxu2 %v1881_v28 }
  0x88   : > { %543 = vmatpush.bf16.msra.mxu1 %v1723_v42  ;;  %1446 = vmatpush.bf16.msra.mxu3 %v1889_v29 }
  0x8b   : > { %515 = vmatpush.bf16.msra.mxu0 %v1711_v47  ;;  %1418 = vmatpush.bf16.msra.mxu2 %v1880_v43 }
  0x8c   : > { %544 = vmatpush.bf16.msra.mxu1 %v1715_v50  ;;  %1447 = vmatpush.bf16.msra.mxu3 %v1888_v44 }
  0x8e   : > { %516 = vmatmul.bf16.vlgmr.msra.gmra.mxu0 %v402_v51 }
  0x8f   : > { %545 = vmatmul.bf16.vlgmr.msra.gmra.mxu1 %v402_v51  ;;  %v1879_v51 = vld [vmem:[%s2555_s7 + $0x10] sm:$0xff] }
  0x90   : > { %1419 = vmatpush.bf16.msra.mxu2 %v1879_v51 }
  0x9e   : > { %521 = vmatmul.bf16.gmra.mxu0 %v403_v54 }
  0x9f   : > { %550 = vmatmul.bf16.gmra.mxu1 %v403_v54 }
  0xae   : > { %526 = vmatmul.bf16.gmra.mxu0 %v404_v57 }
  0xaf   : > { %555 = vmatmul.bf16.gmra.mxu1 %v404_v57  ;;  %v1887_v57 = vld [vmem:[%s2555_s7 + $0x50] sm:$0xff] }
  0xb0   : > { %1448 = vmatpush.bf16.msra.mxu3 %v1887_v57 }
  0xb4   : > { %1449 = vmatpush.bf16.msra.mxu3 %v1886_v10 }
  0xbe   : > { %531 = vmatmul.bf16.gmra.mxu0 %v405_v60 }
  0xbf   : > { %560 = vmatmul.bf16.gmra.mxu1 %v405_v60 }
 0x10b   : > { %v517_v0 = vpop.f32.mrf.mxu0 }
 0x10c   : > { %v2610_v1 = vadd.f32 %v517_v0, %v2605_v62  ;;  %v546_v2 = vpop.f32.mrf.mxu1 }
 0x10d   : > { %v2613_v3 = vadd.f32 %v546_v2, %v2607_v63 }
 0x10e   : > { %v2616_v4 = vmul.f32 0.70710677, %v2610_v1 }
 0x10f   : > { %v2621_v7 = vmul.f32 0.70710677, %v2613_v3  ;;  %v2725_v43 = vmul.f32 0.5, %v2613_v3 }
 0x110   : > { %v598_v8 = vmul.f32 %v2616_v4, %v2616_v4 }
 0x111   : > { %v638_v9 = vmul.f32 %v2621_v7, %v2621_v7 }
 0x112   : > { %v2629_v12 = vmin.f32 %v598_v8, 16.0 }
 0x113   : > { %v519_v13 = vpop.f32.mrf.mxu0  ;;  %v2631_v14 = vmin.f32 %v638_v9, 16.0  ;;  %v1878_v9 = vld [vmem:[%s2555_s7 + $0x8] sm:$0xff] }
 0x114   : > { %v2634_v15 = vadd.f32 %v519_v13, %v2605_v62  ;;  %v548_v16 = vpop.f32.mrf.mxu1  ;;  %v611_v21 = vmul.f32 3.8918573e-05, %v2629_v12  ;;  %v600_v22 = vmul.f32 2.1237322e-06, %v2629_v12  ;;  %1420 = vmatpush.bf16.msra.mxu2 %v1878_v9 }
 0x115   : > { %v2637_v17 = vadd.f32 %v548_v16, %v2607_v63  ;;  %v640_v23 = vmul.f32 2.1237322e-06, %v2631_v14 }
 0x116   : > { %v2640_v18 = vmul.f32 0.70710677, %v2634_v15  ;;  %v612_v30 = vadd.f32 0.001143296, %v611_v21  ;;  %v601_v31 = vadd.f32 0.00028619796, %v600_v22 }
 0x117   : > { %v2643_v19 = vmul.f32 0.70710677, %v2637_v17  ;;  %v641_v32 = vadd.f32 0.00028619796, %v640_v23  ;;  %v2741_v51 = vmul.f32 0.5, %v2637_v17 }
 0x118   : > { %v678_v25 = vmul.f32 %v2640_v18, %v2640_v18  ;;  %v613_v39 = vmul.f32 %v612_v30, %v2629_v12  ;;  %v602_v40 = vmul.f32 %v601_v31, %v2629_v12  ;;  %v1877_v31 = vld [vmem:[%s2555_s7] sm:$0xff] }
 0x119   : > { %v718_v26 = vmul.f32 %v2643_v19, %v2643_v19  ;;  %v642_v41 = vmul.f32 %v641_v32, %v2631_v14  ;;  %v1885_v32 = vld [vmem:[%s2555_s7 + $0x40] sm:$0xff]  ;;  %1421 = vmatpush.bf16.msra.mxu2 %v1877_v31 }
 0x11a   : > { %v2659_v35 = vmin.f32 %v678_v25, 16.0  ;;  %v614_v52 = vadd.f32 0.014752088, %v613_v39  ;;  %v603_v53 = vadd.f32 0.0036580483, %v602_v40  ;;  %1450 = vmatpush.bf16.msra.mxu3 %v1885_v32 }
 0x11b   : > { %v522_v27 = vpop.f32.mrf.mxu0  ;;  %v2661_v36 = vmin.f32 %v718_v26, 16.0  ;;  %v643_v54 = vadd.f32 0.0036580483, %v642_v41 }
 0x11c   : > { %v2657_v33 = vadd.f32 %v522_v27, %v2605_v62  ;;  %v551_v34 = vpop.f32.mrf.mxu1  ;;  %v680_v45 = vmul.f32 2.1237322e-06, %v2659_v35  ;;  %v615_v5 = vmul.f32 %v614_v52, %v2629_v12  ;;  %v604_v6 = vmul.f32 %v603_v53, %v2629_v12 }
 0x11d   : > { %v2664_v37 = vadd.f32 %v551_v34, %v2607_v63  ;;  %v720_v46 = vmul.f32 2.1237322e-06, %v2661_v36  ;;  %v644_v8 = vmul.f32 %v643_v54, %v2631_v14  ;;  %v2720_v34 = vmul.f32 0.5, %v2610_v1 }
 0x11e   : > { %v2667_v38 = vmul.f32 0.70710677, %v2657_v33  ;;  %v681_v58 = vadd.f32 0.00028619796, %v680_v45  ;;  %v616_v25 = vadd.f32 0.112945676, %v615_v5 }
 0x11f   : > { %v2673_v42 = vmul.f32 0.70710677, %v2664_v37  ;;  %v721_v59 = vadd.f32 0.00028619796, %v720_v46  ;;  %v605_v26 = vadd.f32 0.05243302, %v604_v6 }
 0x120   : > { %v758_v47 = vmul.f32 %v2667_v38, %v2667_v38  ;;  %v682_v11 = vmul.f32 %v681_v58, %v2659_v35  ;;  %v645_v27 = vadd.f32 0.05243302, %v644_v8 }
 0x121   : > { %v798_v48 = vmul.f32 %v2673_v42, %v2673_v42  ;;  %v722_v13 = vmul.f32 %v721_v59, %v2661_v36  ;;  %v606_v3 = vmul.f32 %v605_v26, %v2629_v12 }
 0x122   : > { %v2683_v49 = vmin.f32 %v758_v47, 16.0  ;;  %v683_v39 = vadd.f32 0.0036580483, %v682_v11  ;;  %v2734_v47 = vmul.f32 0.5, %v2634_v15  ;;  %v646_v54 = vmul.f32 %v645_v27, %v2631_v14 }
 0x123   : > { %v524_v50 = vpop.f32.mrf.mxu0  ;;  %v2686_v55 = vmin.f32 %v798_v48, 16.0  ;;  %v723_v40 = vadd.f32 0.0036580483, %v722_v13  ;;  %v607_v10 = vadd.f32 0.18741608, %v606_v3 }
 0x124   : > { %v553_v56 = vpop.f32.mrf.mxu1  ;;  %v2690_v60 = vadd.f32 %v524_v50, %v2605_v62  ;;  %v760_v61 = vmul.f32 2.1237322e-06, %v2683_v49  ;;  %v617_v50 = vmul.f32 %v616_v25, %v2629_v12  ;;  %v684_v15 = vmul.f32 %v683_v39, %v2659_v35 }
 0x125   : > { %v2694_v0 = vadd.f32 %v553_v56, %v2607_v63  ;;  %v800_v2 = vmul.f32 2.1237322e-06, %v2686_v55  ;;  %v724_v56 = vmul.f32 %v723_v40, %v2661_v36 }
 0x126   : > { %v2705_v16 = vmul.f32 0.70710677, %v2690_v60  ;;  %v761_v20 = vadd.f32 0.00028619796, %v760_v61  ;;  %v618_v9 = vadd.f32 0.4994258, %v617_v50 }
 0x127   : > { %v2708_v21 = vmul.f32 0.70710677, %v2694_v0  ;;  %v801_v22 = vadd.f32 0.00028619796, %v800_v2  ;;  %v2756_v2 = vmul.f32 0.5, %v2657_v33 }
 0x128   : > { %v838_v23 = vmul.f32 %v2705_v16, %v2705_v16  ;;  %v762_v44 = vmul.f32 %v761_v20, %v2683_v49  ;;  %v725_v26 = vadd.f32 0.05243302, %v724_v56  ;;  %v619_v40 = vmul.f32 %v618_v9, %v2629_v12 }
 0x129   : > { %v878_v28 = vmul.f32 %v2708_v21, %v2708_v21  ;;  %v802_v1 = vmul.f32 %v801_v22, %v2686_v55 }
 0x12a   : > { %v2722_v41 = vmin.f32 %v838_v23, 16.0  ;;  %v763_v58 = vadd.f32 0.0036580483, %v762_v44  ;;  %v647_v23 = vadd.f32 0.18741608, %v646_v54  ;;  %v608_v44 = vmul.f32 %v607_v10, %v2629_v12 }
 0x12b   : > { %v527_v24 = vpop.f32.mrf.mxu0  ;;  %v2728_v45 = vmin.f32 %v878_v28, 16.0  ;;  %v803_v5 = vadd.f32 0.0036580483, %v802_v1  ;;  %v726_v56 = vmul.f32 %v725_v26, %v2661_v36 }
 0x12c   : > { %v2715_v29 = vadd.f32 %v527_v24, %v2605_v62  ;;  %v556_v30 = vpop.f32.mrf.mxu1  ;;  %v840_v48 = vmul.f32 2.1237322e-06, %v2722_v41  ;;  %v685_v24 = vadd.f32 0.05243302, %v684_v15  ;;  %v764_v27 = vmul.f32 %v763_v58, %v2683_v49 }
 0x12d   : > { %v2731_v46 = vadd.f32 %v556_v30, %v2607_v63  ;;  %v880_v52 = vmul.f32 2.1237322e-06, %v2728_v45  ;;  %v804_v31 = vmul.f32 %v803_v5, %v2686_v55  ;;  %v648_v3 = vmul.f32 %v647_v23, %v2631_v14 }
 0x12e   : > { %v2745_v53 = vmul.f32 0.70710677, %v2715_v29  ;;  %v841_v57 = vadd.f32 0.00028619796, %v840_v48  ;;  %v609_v23 = vadd.f32 1.1283791, %v608_v44 }
 0x12f   : > { %v881_v59 = vadd.f32 0.00028619796, %v880_v52  ;;  %v2753_v17 = vmul.f32 0.70710677, %v2731_v46  ;;  %v686_v52 = vmul.f32 %v685_v24, %v2659_v35  ;;  %v805_v12 = vadd.f32 0.05243302, %v804_v31 }
 0x130   : > { %v918_v61 = vmul.f32 %v2745_v53, %v2745_v53  ;;  %v842_v6 = vmul.f32 %v841_v57, %v2722_v41  ;;  %v765_v57 = vadd.f32 0.05243302, %v764_v27  ;;  %v727_v44 = vadd.f32 0.18741608, %v726_v56 }
 0x131   : > { %v882_v11 = vmul.f32 %v881_v59, %v2728_v45  ;;  %v958_v20 = vmul.f32 %v2753_v17, %v2753_v17  ;;  %v687_v27 = vadd.f32 0.18741608, %v686_v52 }
 0x132   : > { %v2760_v13 = vmin.f32 %v918_v61, 16.0  ;;  %v843_v25 = vadd.f32 0.0036580483, %v842_v6 }
 0x133   : > { %v529_v8 = vpop.f32.mrf.mxu0  ;;  %v2769_v30 = vmin.f32 %v958_v20, 16.0  ;;  %v883_v1 = vadd.f32 0.0036580483, %v882_v11 }
 0x134   : > { %v558_v22 = vpop.f32.mrf.mxu1  ;;  %v2765_v33 = vadd.f32 %v529_v8, %v2605_v62  ;;  %v920_v28 = vmul.f32 2.1237322e-06, %v2760_v13  ;;  %v844_v54 = vmul.f32 %v843_v25, %v2722_v41  ;;  %v2793_v8 = vadd.f32 1.0, %v619_v40 }
 0x135   : > { %v2776_v39 = vadd.f32 %v558_v22, %v2607_v63  ;;  %v960_v50 = vmul.f32 2.1237322e-06, %v2769_v30  ;;  %v884_v9 = vmul.f32 %v883_v1, %v2728_v45 }
 0x136   : > { %v2773_v32 = vmul.f32 0.70710677, %v2765_v33  ;;  %v921_v48 = vadd.f32 0.00028619796, %v920_v28  ;;  %v845_v24 = vadd.f32 0.05243302, %v844_v54  ;;  %2019 = vrcp.f32 %v2793_v8 }
 0x137   : > { %v961_v59 = vadd.f32 0.00028619796, %v960_v50  ;;  %v2791_v5 = vmul.f32 0.70710677, %v2776_v39  ;;  %v766_v54 = vmul.f32 %v765_v57, %v2683_v49  ;;  %v885_v52 = vadd.f32 0.05243302, %v884_v9 }
 0x138   : > { %v998_v15 = vmul.f32 %v2773_v32, %v2773_v32  ;;  %v922_v58 = vmul.f32 %v921_v48, %v2760_v13  ;;  %v688_v9 = vmul.f32 %v687_v27, %v2659_v35  ;;  %vm626_vm1 = vweird.f32 %v2793_v8 }
 0x139   : > { %v962_v11 = vmul.f32 %v961_v59, %v2769_v30  ;;  %v1038_v26 = vmul.f32 %v2791_v5, %v2791_v5 }
 0x13a   : > { %v2788_v61 = vmin.f32 %v998_v15, 16.0  ;;  %v923_v10 = vadd.f32 0.0036580483, %v922_v58  ;;  %v806_v15 = vmul.f32 %v805_v12, %v2686_v55  ;;  %v846_v58 = vmul.f32 %v845_v24, %v2722_v41 }
 0x13b   : > { %v532_v6 = vpop.f32.mrf.mxu0  ;;  %v963_v31 = vadd.f32 0.0036580483, %v962_v11  ;;  %v2807_v48 = vmin.f32 %v1038_v26, 16.0  ;;  %v2820_v11 = vmul.f32 0.5, %v2664_v37  ;;  %v649_v12 = vadd.f32 1.1283791, %v648_v3 }
 0x13c   : > { %v2798_v20 = vadd.f32 %v532_v6, %v2605_v62  ;;  %v561_v22 = vpop.f32.mrf.mxu1  ;;  %v1000_v25 = vmul.f32 2.1237322e-06, %v2788_v61  ;;  %v924_v28 = vmul.f32 %v923_v10, %v2760_v13  ;;  %v728_v37 = vmul.f32 %v727_v44, %v2661_v36 }
 0x13d   : > { %v2805_v40 = vadd.f32 %v561_v22, %v2607_v63  ;;  %3406 = vst [vmem:[#allocation31_spill] sm:$0xff] %v2820_v11  ;;  %v964_v22 = vmul.f32 %v963_v31, %v2769_v30  ;;  %v1040_v56 = vmul.f32 2.1237322e-06, %v2807_v48  ;;  %v886_v31 = vmul.f32 %v885_v52, %v2728_v45 }
 0x13e   : > { %3404 = vst [vmem:[#allocation29_spill] sm:$0xff] %v2798_v20  ;;  %v1001_v1 = vadd.f32 0.00028619796, %v1000_v25  ;;  %v2810_v50 = vmul.f32 0.70710677, %v2798_v20  ;;  %v2835_v20 = vpop.eup %2019  ;;  %v2847_v44 = vmul.f32 %v649_v12, %v2621_v7 }
 0x13f   : > { %3405 = vst [vmem:[#allocation30_spill] sm:$0xff] %v2805_v40  ;;  %v925_v59 = vadd.f32 0.05243302, %v924_v28  ;;  %v2825_v57 = vmul.f32 0.70710677, %v2805_v40  ;;  %v2831_v28 = vmul.f32 %v609_v23, %v2616_v4  ;;  %v2838_v40 = vmul.f32 0.5, %v2690_v60 }
 0x140   : > { %v1002_v6 = vmul.f32 %v1001_v1, %v2788_v61  ;;  %v1078_v10 = vmul.f32 %v2810_v50, %v2810_v50  ;;  %v767_v1 = vadd.f32 0.18741608, %v766_v54  ;;  %v807_v11 = vadd.f32 0.18741608, %v806_v15 }
 0x141   : > { %3407 = vst [vmem:[#allocation32_spill] sm:$0xff] %v2825_v57  ;;  %v847_v3 = vadd.f32 0.18741608, %v846_v58  ;;  %v926_v27 = vmul.f32 %v925_v59, %v2760_v13  ;;  %v1118_v4 = vmul.f32 %v2825_v57, %v2825_v57  ;;  %v689_v54 = vadd.f32 1.1283791, %v688_v9 }
 0x142   : > { %v1003_v24 = vadd.f32 0.0036580483, %v1002_v6  ;;  %v2828_v25 = vmin.f32 %v1078_v10, 16.0  ;;  %v965_v6 = vadd.f32 0.05243302, %v964_v22  ;;  %v768_v58 = vmul.f32 %v767_v1, %v2683_v49 }
 0x143   : > { %v534_v26 = vpop.f32.mrf.mxu0  ;;  %v1041_v10 = vadd.f32 0.00028619796, %v1040_v56  ;;  %v729_v52 = vadd.f32 1.1283791, %v728_v37  ;;  %v887_v59 = vadd.f32 0.18741608, %v886_v31  ;;  %v622_v22 = vmul.f32 %v2835_v20, %v2793_v8 }
 0x144   : > { %v2844_v23 = vadd.f32 %v534_v26, %v2605_v62  ;;  %v1004_v15 = vmul.f32 %v1003_v24, %v2788_v61  ;;  %v1080_v60 = vmul.f32 2.1237322e-06, %v2828_v25  ;;  %v808_v56 = vmul.f32 %v807_v11, %v2686_v55 }
 0x145   : > { %v848_v62 = vmul.f32 %v847_v3, %v2722_v41  ;;  %v2857_v26 = vmul.f32 0.5, %v2694_v0  ;;  %v927_v7 = vadd.f32 0.18741608, %v926_v27  ;;  %v966_v12 = vmul.f32 %v965_v6, %v2769_v30 }
 0x146   : > { %3408 = vst [vmem:[#allocation33_spill] sm:$0xff] %v2844_v23  ;;  %v1042_v9 = vmul.f32 %v1041_v10, %v2807_v48  ;;  %v2861_v24 = vmin.f32 %v1118_v4, 16.0  ;;  %v2864_v37 = vmul.f32 0.70710677, %v2844_v23  ;;  %v2867_v1 = vmul.f32 %v689_v54, %v2640_v18  ;;  %v563_v18 = vpop.f32.mrf.mxu1 }
 0x147   : > { %3409 = vst [vmem:[#allocation34_spill] sm:$0xff] %v2857_v26  ;;  %v2870_v11 = vmul.f32 0.5, %v2715_v29  ;;  %v1005_v31 = vadd.f32 0.05243302, %v1004_v15  ;;  %v1081_v3 = vadd.f32 0.00028619796, %v1080_v60  ;;  %v2873_v0 = vmul.f32 %v729_v52, %v2643_v19 }
 0x148   : > { %3410 = vst [vmem:[#allocation35_spill] sm:$0xff] %v2864_v37  ;;  %v769_v27 = vadd.f32 1.1283791, %v768_v58  ;;  %v888_v6 = vmul.f32 %v887_v59, %v2728_v45  ;;  %v623_v10 = vsub.f32 1.0, %v622_v22  ;;  %v809_v4 = vadd.f32 1.1283791, %v808_v56 }
 0x149   : > { %v849_v57 = vadd.f32 1.1283791, %v848_v62  ;;  %v928_v23 = vmul.f32 %v927_v7, %v2760_v13  ;;  %v2878_v26 = vmul.f32 0.5, %v2731_v46  ;;  %v967_v54 = vadd.f32 0.18741608, %v966_v12 }
 0x14a   : > { %v1043_v29 = vadd.f32 0.0036580483, %v1042_v9  ;;  %v1120_v15 = vmul.f32 2.1237322e-06, %v2861_v24  ;;  %v1158_v19 = vmul.f32 %v2864_v37, %v2864_v37  ;;  %v1006_v60 = vmul.f32 %v1005_v31, %v2788_v61 }
 0x14b   : > { %3411 = vst [vmem:[#allocation36_spill] sm:$0xff] %v2878_v26  ;;  %v1082_v52 = vmul.f32 %v1081_v3, %v2828_v25  ;;  %v624_v58 = vmul.f32 %v2835_v20, %v623_v10  ;;  %v691_v59 = vmul.f32 3.8918573e-05, %v2659_v35  ;;  %v2888_v22 = vmul.f32 %v769_v27, %v2667_v38 }
 0x14c   : > { %v889_v46 = vadd.f32 1.1283791, %v888_v6  ;;  %v2891_v56 = vmul.f32 0.5, %v2765_v33  ;;  %v2894_v62 = vadd.f32 %v563_v18, %v2607_v63  ;;  %v2897_v7 = vmul.f32 %v809_v4, %v2673_v42 }
 0x14d   : > { %v2900_v12 = vmul.f32 %v849_v57, %v2705_v16  ;;  %v929_v9 = vadd.f32 1.1283791, %v928_v23  ;;  %v2903_v31 = vmul.f32 0.5, %v2776_v39  ;;  %v968_v38 = vmul.f32 %v967_v54, %v2769_v30 }
 0x14e   : > { %3412 = vst [vmem:[#allocation37_spill] sm:$0xff] %v2894_v62  ;;  %v1044_v3 = vmul.f32 %v1043_v29, %v2807_v48  ;;  %v1121_v27 = vadd.f32 0.00028619796, %v1120_v15  ;;  %v2907_v33 = vmin.f32 %v1158_v19, 16.0  ;;  %v1007_v6 = vadd.f32 0.18741608, %v1006_v60 }
 0x14f   : > { %3413 = vst [vmem:[#allocation38_spill] sm:$0xff] %v2903_v31  ;;  %v1083_v63 = vadd.f32 0.0036580483, %v1082_v52  ;;  %v625_v10 = vadd.f32 %v2835_v20, %v624_v58  ;;  %vm627_vm0 = vweird.f32 %v2835_v20  ;;  %v2912_v42 = vmul.f32 %v889_v46, %v2708_v21 }
 0x150   : > { %v2915_v16 = vmul.f32 0.70710677, %v2894_v62  ;;  %v632_v39 = vand.u32 2147483648, %v2793_v8  ;;  %v692_v57 = vadd.f32 0.001143296, %v691_v59  ;;  %v2919_v23 = vmul.f32 %v929_v9, %v2745_v53  ;;  %vm2926_vm2 = vmor %vm626_vm1, %vm627_vm0 }
 0x151   : > { %v630_v4 = vand.u32 2147483647, %v2793_v8  ;;  %v651_v18 = vmul.f32 3.8918573e-05, %v2631_v14  ;;  %v1045_v54 = vadd.f32 0.05243302, %v1044_v3  ;;  %v1122_v29 = vmul.f32 %v1121_v27, %v2861_v24 }
 0x152   : > { %3414 = vst [vmem:[#allocation39_spill] sm:$0xff] %v2915_v16  ;;  %v1160_v21 = vmul.f32 2.1237322e-06, %v2907_v33  ;;  %v693_v19 = vmul.f32 %v692_v57, %v2659_v35  ;;  %v969_v60 = vadd.f32 1.1283791, %v968_v38  ;;  %v629_v53 = vsel %vm2926_vm2, %v2835_v20, %v625_v10 }
 0x153   : > { %v652_v52 = vadd.f32 0.001143296, %v651_v18  ;;  %v731_v8 = vmul.f32 3.8918573e-05, %v2661_v36  ;;  %v1008_v58 = vmul.f32 %v1007_v6, %v2788_v61  ;;  %v1084_v59 = vmul.f32 %v1083_v63, %v2828_v25 }
 0x154   : > { %v1198_v46 = vmul.f32 %v2915_v16, %v2915_v16  ;;  %v633_v9 = vor.u32 1.1754944e-38, %v632_v39  ;;  %vm631_vm3 = vcmp.eq.f32.partialorder %v630_v4, 8.507059e+37  ;;  %v694_v3 = vadd.f32 0.014752088, %v693_v19 }
 0x155   : > { %v653_v27 = vmul.f32 %v652_v52, %v2631_v14  ;;  %v732_v38 = vadd.f32 0.001143296, %v731_v8  ;;  %v1046_v57 = vmul.f32 %v1045_v54, %v2807_v48  ;;  %v1123_v15 = vadd.f32 0.0036580483, %v1122_v29 }
 0x156   : > { %v1161_v20 = vadd.f32 0.00028619796, %v1160_v21  ;;  %v634_v10 = vsel %vm631_vm3, %v633_v9, %v629_v53  ;;  %v695_v18 = vmul.f32 %v694_v3, %v2659_v35  ;;  %v771_v63 = vmul.f32 3.8918573e-05, %v2683_v49 }
 0x157   : > { %v654_v62 = vadd.f32 0.014752088, %v653_v27  ;;  %v733_v6 = vmul.f32 %v732_v38, %v2661_v36  ;;  %v2945_v16 = vmul.f32 %v969_v60, %v2753_v17  ;;  %v1009_v39 = vadd.f32 1.1283791, %v1008_v58 }
 0x158   : > { %v1085_v4 = vadd.f32 0.05243302, %v1084_v59  ;;  %v2947_v19 = vmin.f32 %v1198_v46, 16.0  ;;  %v696_v52 = vadd.f32 0.112945676, %v695_v18  ;;  %v1162_v8 = vmul.f32 %v1161_v20, %v2907_v33 }
 0x159   : > { %v655_v54 = vmul.f32 %v654_v62, %v2631_v14  ;;  %v734_v29 = vadd.f32 0.014752088, %v733_v6  ;;  %v772_v21 = vadd.f32 0.001143296, %v771_v63  ;;  %v1047_v53 = vadd.f32 0.18741608, %v1046_v57 }
 0x15a   : > { %v635_v9 = vmul.f32 %v634_v10, %v2831_v28  ;;  %v851_v3 = vmul.f32 3.8918573e-05, %v2722_v41  ;;  %v697_v27 = vmul.f32 %v696_v52, %v2659_v35  ;;  %v1086_v59 = vmul.f32 %v1085_v4, %v2828_v25 }
 0x15b   : > { %v656_v17 = vadd.f32 0.112945676, %v655_v54  ;;  %v735_v60 = vmul.f32 %v734_v29, %v2661_v36  ;;  %v773_v58 = vmul.f32 %v772_v21, %v2683_v49  ;;  %v1200_v62 = vmul.f32 2.1237322e-06, %v2947_v19 }
 0x15c   : > { %v852_v46 = vadd.f32 0.001143296, %v851_v3  ;;  %v811_v38 = vmul.f32 3.8918573e-05, %v2686_v55  ;;  %v698_v57 = vadd.f32 0.4994258, %v697_v27  ;;  %v1048_v3 = vmul.f32 %v1047_v53, %v2807_v48 }
 0x15d   : > { %v657_v20 = vmul.f32 %v656_v17, %v2631_v14  ;;  %v736_v28 = vadd.f32 0.112945676, %v735_v60  ;;  %v774_v10 = vadd.f32 0.014752088, %v773_v58  ;;  %v1163_v18 = vadd.f32 0.0036580483, %v1162_v8 }
 0x15e   : > { %v1772_v6 = vclamps-f32 %v635_v9, 1.0  ;;  %v853_v63 = vmul.f32 %v852_v46, %v2722_v41  ;;  %v812_v52 = vadd.f32 0.001143296, %v811_v38  ;;  %v699_v54 = vmul.f32 %v698_v57, %v2659_v35 }
 0x15f   : > { %v658_v29 = vadd.f32 0.4994258, %v657_v20  ;;  %v737_v4 = vmul.f32 %v736_v28, %v2661_v36  ;;  %v775_v21 = vmul.f32 %v774_v10, %v2683_v49  ;;  %v1124_v27 = vmul.f32 %v1123_v15, %v2861_v24 }
 0x160   : > { %v854_v37 = vadd.f32 0.014752088, %v853_v63  ;;  %v813_v17 = vmul.f32 %v812_v52, %v2686_v55  ;;  %v2967_v60 = vadd.f32 1.0, %v699_v54  ;;  %v1087_v46 = vadd.f32 0.18741608, %v1086_v59 }
 0x161   : > { %v659_v8 = vmul.f32 %v658_v29, %v2631_v14  ;;  %v738_v9 = vadd.f32 0.4994258, %v737_v4  ;;  %v776_v58 = vadd.f32 0.112945676, %v775_v21  ;;  %v891_v57 = vmul.f32 3.8918573e-05, %v2728_v45 }
 0x162   : > { %v855_v35 = vmul.f32 %v854_v37, %v2722_v41  ;;  %v814_v38 = vadd.f32 0.014752088, %v813_v17  ;;  %v1164_v20 = vmul.f32 %v1163_v18, %v2907_v33  ;;  %v1201_v53 = vadd.f32 0.00028619796, %v1200_v62 }
 0x163   : > { %2021 = vrcp.f32 %v2967_v60  ;;  %v1238_v15 = vadd.f32 1.0, %v1772_v6  ;;  %v2974_v28 = vadd.f32 1.0, %v659_v8  ;;  %v739_v10 = vmul.f32 %v738_v9, %v2661_v36 }
 0x164   : > { %v777_v14 = vmul.f32 %v776_v58, %v2683_v49  ;;  %v856_v63 = vadd.f32 0.112945676, %v855_v35  ;;  %v2979_v59 = vmul.f32 %v1009_v39, %v2773_v32  ;;  %v2981_v37 = vadd.f32 1.1283791, %v1048_v3 }
 0x165   : > { %v2983_v52 = vadd.f32 0.05243302, %v1124_v27  ;;  %v815_v18 = vmul.f32 %v814_v38, %v2686_v55  ;;  %v710_v62 = vand.u32 2147483647, %v2967_v60  ;;  %v712_v6 = vand.u32 2147483648, %v2967_v60 }
 0x166   : > { %2023 = vrcp.f32 %v2974_v28  ;;  %v892_v54 = vadd.f32 0.001143296, %v891_v57  ;;  %v2989_v36 = vadd.f32 1.0, %v739_v10  ;;  %v778_v29 = vadd.f32 0.4994258, %v777_v14 }
 0x167   : > { %3417 = vst [vmem:[#allocation40_spill] sm:$0xff] %v2983_v52  ;;  %v857_v4 = vmul.f32 %v856_v63, %v2722_v41  ;;  %v816_v32 = vadd.f32 0.112945676, %v815_v18  ;;  %v2993_v39 = vmul.f32 %v1087_v46, %v2828_v25  ;;  %v2995_v21 = vadd.f32 0.05243302, %v1164_v20 }
 0x168   : > { %v2998_v3 = vmul.f32 %v1201_v53, %v2947_v19  ;;  %v3001_v27 = vmul.f32 %v1238_v15, %v2720_v34  ;;  %vm706_vm4 = vweird.f32 %v2967_v60  ;;  %v670_v8 = vand.u32 2147483647, %v2974_v28 }
 0x169   : > { %v2022_v17 = vpop.eup %2021  ;;  %v672_v9 = vand.u32 2147483648, %v2974_v28  ;;  %2025 = vrcp.f32 %v2989_v36  ;;  %vm3008_vm5 = vcmp.eq.f32.partialorder %v710_v62, 8.507059e+37  ;;  %v779_v35 = vmul.f32 %v778_v29, %v2683_v49 }
 0x16a   : > { %v702_v58 = vmul.f32 %v2022_v17, %v2967_v60  ;;  %v858_v38 = vadd.f32 0.4994258, %v857_v4  ;;  %v893_v34 = vmul.f32 %v892_v54, %v2728_v45  ;;  %v713_v57 = vor.u32 1.1754944e-38, %v712_v6 }
 0x16b   : > { %vm666_vm6 = vweird.f32 %v2974_v28  ;;  %v750_v20 = vand.u32 2147483647, %v2989_v36  ;;  %v817_v53 = vmul.f32 %v816_v32, %v2686_v55  ;;  %v752_v14 = vand.u32 2147483648, %v2989_v36 }
 0x16c   : > { %v2024_v15 = vpop.eup %2023  ;;  %v703_v10 = vsub.f32 1.0, %v702_v58  ;;  %v3018_v63 = vadd.f32 1.0, %v779_v35  ;;  %v859_v18 = vmul.f32 %v858_v38, %v2722_v41  ;;  %vm3022_vm7 = vcmp.eq.f32.partialorder %v670_v8, 8.507059e+37 }
 0x16d   : > { %v662_v49 = vmul.f32 %v2024_v15, %v2974_v28  ;;  %v673_v6 = vor.u32 1.1754944e-38, %v672_v9  ;;  %v818_v54 = vadd.f32 0.4994258, %v817_v53  ;;  %v931_v29 = vmul.f32 3.8918573e-05, %v2760_v13 }
 0x16e   : > { %v704_v4 = vmul.f32 %v2022_v17, %v703_v10  ;;  %vm707_vm8 = vweird.f32 %v2022_v17  ;;  %2027 = vrcp.f32 %v3018_v63  ;;  %v894_v32 = vadd.f32 0.014752088, %v893_v34 }
 0x16f   : > { %v2026_v58 = vpop.eup %2025  ;;  %v663_v35 = vsub.f32 1.0, %v662_v49  ;;  %vm746_vm9 = vweird.f32 %v2989_v36  ;;  %v3029_v41 = vadd.f32 1.0, %v859_v18  ;;  %v819_v8 = vmul.f32 %v818_v54, %v2686_v55  ;;  %vm708_vm12 = vmor %vm706_vm4, %vm707_vm8 }
 0x170   : > { %v705_v38 = vadd.f32 %v2022_v17, %v704_v4  ;;  %vm667_vm10 = vweird.f32 %v2024_v15  ;;  %v742_v9 = vmul.f32 %v2026_v58, %v2989_v36  ;;  %vm3033_vm11 = vcmp.eq.f32.partialorder %v750_v20, 8.507059e+37 }
 0x171   : > { %v753_v10 = vor.u32 1.1754944e-38, %v752_v14  ;;  %v664_v34 = vmul.f32 %v2024_v15, %v663_v35  ;;  %v790_v49 = vand.u32 2147483647, %v3018_v63  ;;  %v792_v18 = vand.u32 2147483648, %v3018_v63  ;;  %vm668_vm14 = vmor %vm666_vm6, %vm667_vm10 }
 0x172   : > { %2029 = vrcp.f32 %v3029_v41  ;;  %v709_v55 = vsel %vm708_vm12, %v2022_v17, %v705_v38  ;;  %v743_v54 = vsub.f32 1.0, %v742_v9  ;;  %v895_v4 = vmul.f32 %v894_v32, %v2728_v45 }
 0x173   : > { %v932_v52 = vadd.f32 0.001143296, %v931_v29  ;;  %v714_v20 = vsel %vm3008_vm5, %v713_v57, %v709_v55  ;;  %v665_v31 = vadd.f32 %v2024_v15, %v664_v34  ;;  %vm786_vm13 = vweird.f32 %v3018_v63 }
 0x174   : > { %v872_v60 = vand.u32 2147483648, %v3029_v41  ;;  %v3047_v14 = vadd.f32 1.0, %v819_v8  ;;  %v2028_v35 = vpop.eup %2027  ;;  %v715_v26 = vmul.f32 %v714_v20, %v2867_v1  ;;  %v744_v17 = vmul.f32 %v2026_v58, %v743_v54 }
 0x175   : > { %vm747_vm15 = vweird.f32 %v2026_v58  ;;  %v870_v29 = vand.u32 2147483647, %v3029_v41  ;;  %v669_v46 = vsel %vm668_vm14, %v2024_v15, %v665_v31  ;;  %v782_v57 = vmul.f32 %v2028_v35, %v3018_v63 }
 0x176   : > { %vm3055_vm0 = vcmp.eq.f32.partialorder %v790_v49, 8.507059e+37  ;;  %v793_v8 = vor.u32 1.1754944e-38, %v792_v18  ;;  %2031 = vrcp.f32 %v3047_v14  ;;  %v1774_v38 = vclamps-f32 %v715_v26, 1.0  ;;  %vm748_vm2 = vmor %vm746_vm9, %vm747_vm15 }
 0x177   : > { %v674_v1 = vsel %vm3022_vm7, %v673_v6, %v669_v46  ;;  %v745_v28 = vadd.f32 %v2026_v58, %v744_v17  ;;  %vm866_vm1 = vweird.f32 %v3029_v41  ;;  %v783_v31 = vsub.f32 1.0, %v782_v57 }
 0x178   : > { %v2030_v9 = vpop.eup %2029  ;;  %v675_v34 = vmul.f32 %v674_v1, %v2847_v44  ;;  %v873_v15 = vor.u32 1.1754944e-38, %v872_v60  ;;  %v896_v49 = vadd.f32 0.112945676, %v895_v4  ;;  %v1240_v55 = vadd.f32 1.0, %v1774_v38 }
 0x179   : > { %v749_v18 = vsel %vm748_vm2, %v2026_v58, %v745_v28  ;;  %vm787_vm3 = vweird.f32 %v2028_v35  ;;  %v862_v26 = vmul.f32 %v2030_v9, %v3029_v41  ;;  %vm3067_vm4 = vcmp.eq.f32.partialorder %v870_v29, 8.507059e+37 }
 0x17a   : > { %v1773_v6 = vclamps-f32 %v675_v34, 1.0  ;;  %v754_v54 = vsel %vm3033_vm11, %v753_v10, %v749_v18  ;;  %v784_v44 = vmul.f32 %v2028_v35, %v783_v31  ;;  %v830_v36 = vand.u32 2147483647, %v3047_v14  ;;  %vm788_vm7 = vmor %vm786_vm13, %vm787_vm3 }
 0x17b   : > { %v1256_v20 = vmul.f32 %v1240_v55, %v2734_v47  ;;  %v755_v4 = vmul.f32 %v754_v54, %v2873_v0  ;;  %v863_v60 = vsub.f32 1.0, %v862_v26  ;;  %vm867_vm5 = vweird.f32 %v2030_v9 }
 0x17c   : > { %vm826_vm6 = vweird.f32 %v3047_v14  ;;  %v2032_v58 = vpop.eup %2031  ;;  %v1239_v17 = vadd.f32 1.0, %v1773_v6  ;;  %v785_v29 = vadd.f32 %v2028_v35, %v784_v44  ;;  %v897_v46 = vmul.f32 %v896_v49, %v2728_v45  ;;  %vm868_vm8 = vmor %vm866_vm1, %vm867_vm5 }
 0x17d   : > { %v933_v57 = vmul.f32 %v932_v52, %v2760_v13  ;;  %v1278_v53 = vpack.c.bf16 %v1256_v20, %v3001_v27  ;;  %v1775_v10 = vclamps-f32 %v755_v4, 1.0  ;;  %v864_v47 = vmul.f32 %v2030_v9, %v863_v60 }
 0x17e   : > { %v822_v0 = vmul.f32 %v2032_v58, %v3047_v14  ;;  %v1255_v38 = vmul.f32 %v1239_v17, %v2725_v43  ;;  %v789_v1 = vsel %vm788_vm7, %v2028_v35, %v785_v29  ;;  %v832_v28 = vand.u32 2147483648, %v3047_v14 }
 0x17f   : > { %v898_v34 = vadd.f32 0.4994258, %v897_v46  ;;  %1422 = vmatmul.bf16.vlgmr.msra.gmra.mxu2 %v1278_v53  ;;  %v1241_v31 = vadd.f32 1.0, %v1775_v10  ;;  %v794_v52 = vsel %vm3055_vm0, %v793_v8, %v789_v1  ;;  %v865_v27 = vadd.f32 %v2030_v9, %v864_v47 }
 0x180   : > { %v823_v49 = vsub.f32 1.0, %v822_v0  ;;  %v795_v55 = vmul.f32 %v794_v52, %v2888_v22  ;;  %v934_v43 = vadd.f32 0.014752088, %v933_v57  ;;  %v1011_v35 = vmul.f32 3.8918573e-05, %v2788_v61 }
 0x181   : > { %v899_v63 = vmul.f32 %v898_v34, %v2728_v45  ;;  %v1257_v18 = vmul.f32 %v1241_v31, %v2741_v51  ;;  %v869_v26 = vsel %vm868_vm8, %v2030_v9, %v865_v27  ;;  %vm827_vm9 = vweird.f32 %v2032_v58 }
 0x182   : > { %v824_v6 = vmul.f32 %v2032_v58, %v823_v49  ;;  %v1776_v32 = vclamps-f32 %v795_v55, 1.0  ;;  %v874_v8 = vsel %vm3067_vm4, %v873_v15, %v869_v26  ;;  %v935_v22 = vmul.f32 %v934_v43, %v2760_v13  ;;  %vm828_vm10 = vmor %vm826_vm6, %vm827_vm9 }
 0x183   : > { %v3097_v54 = vadd.f32 1.0, %v899_v63  ;;  %v1279_v41 = vpack.c.bf16 %v1257_v18, %v1255_v38  ;;  %v875_v44 = vmul.f32 %v874_v8, %v2900_v12  ;;  %v1012_v20 = vadd.f32 0.001143296, %v1011_v35 }
 0x184   : > { %v825_v45 = vadd.f32 %v2032_v58, %v824_v6  ;;  %v1242_v4 = vadd.f32 1.0, %v1776_v32  ;;  %v833_v51 = vor.u32 1.1754944e-38, %v832_v28  ;;  %v971_v9 = vmul.f32 3.8918573e-05, %v2769_v30 }
 0x185   : > { %2033 = vrcp.f32 %v3097_v54  ;;  %1451 = vmatmul.bf16.vlgmr.msra.gmra.mxu3 %v1279_v41  ;;  %v1778_v15 = vclamps-f32 %v875_v44, 1.0  ;;  %vm831_vm11 = vcmp.eq.f32.partialorder %v830_v36, 8.507059e+37  ;;  %v936_v60 = vadd.f32 0.112945676, %v935_v22 }
 0x186   : > { %v829_v62 = vsel %vm828_vm10, %v2032_v58, %v825_v45  ;;  %v3107_v17 = vmul.f32 %v2981_v37, %v2791_v5  ;;  %v3110_v12 = vadd.f32 1.1283791, %v2993_v39  ;;  %v1013_v14 = vmul.f32 %v1012_v20, %v2788_v61 }
 0x187   : > { %v834_v29 = vsel %vm831_vm11, %v833_v51, %v829_v62  ;;  %v1166_v46 = vmul.f32 %v2995_v21, %v2907_v33  ;;  %v3116_v57 = vadd.f32 0.0036580483, %v2998_v3  ;;  %v1244_v53 = vadd.f32 1.0, %v1778_v15 }
 0x188   : > { %v937_v36 = vmul.f32 %v936_v60, %v2760_v13  ;;  %v1258_v58 = vmul.f32 %v1242_v4, %v2756_v2  ;;  %v1014_v10 = vadd.f32 0.014752088, %v1013_v14  ;;  %v972_v5 = vadd.f32 0.001143296, %v971_v9 }
 0x189   : > { %v1051_v37 = vmul.f32 3.8918573e-05, %v2807_v48  ;;  %v1260_v39 = vmul.f32 %v1244_v53, %v2838_v40  ;;  %v835_v47 = vmul.f32 %v834_v29, %v2897_v7  ;;  %v1091_v38 = vmul.f32 3.8918573e-05, %v2828_v25 }
 0x18a   : > { %v938_v0 = vadd.f32 0.4994258, %v937_v36  ;;  %v1015_v3 = vmul.f32 %v1014_v10, %v2788_v61  ;;  %v973_v1 = vmul.f32 %v972_v5, %v2769_v30  ;;  %v1171_v34 = vmul.f32 3.8918573e-05, %v2907_v33 }
 0x18b   : > { %v2034_v21 = vpop.eup %2033  ;;  %v1052_v28 = vadd.f32 0.001143296, %v1051_v37  ;;  %v1280_v2 = vpack.c.bf16 %v1260_v39, %v1258_v58  ;;  %v910_v52 = vand.u32 2147483647, %v3097_v54  ;;  %v912_v40 = vand.u32 2147483648, %v3097_v54 }
 0x18c   : > { %v902_v31 = vmul.f32 %v2034_v21, %v3097_v54  ;;  %v939_v7 = vmul.f32 %v938_v0, %v2760_v13  ;;  %v1016_v27 = vadd.f32 0.112945676, %v1015_v3  ;;  %v974_v49 = vadd.f32 0.014752088, %v973_v1 }
 0x18d   : > { %v1053_v55 = vmul.f32 %v1052_v28, %v2807_v48  ;;  %v1777_v63 = vclamps-f32 %v835_v47, 1.0  ;;  %v1092_v35 = vadd.f32 0.001143296, %v1091_v38  ;;  %v1172_v18 = vadd.f32 0.001143296, %v1171_v34  ;;  %v3428_v28 = vld [vmem:[#allocation31_spill] sm:$0xff] }
 0x18e   : > { %v903_v43 = vsub.f32 1.0, %v902_v31  ;;  %v3132_v26 = vadd.f32 1.0, %v939_v7  ;;  %v1017_v6 = vmul.f32 %v1016_v27, %v2788_v61  ;;  %v975_v32 = vmul.f32 %v974_v49, %v2769_v30 }
 0x18f   : > { %v1054_v8 = vadd.f32 0.014752088, %v1053_v55  ;;  %1427 = vmatmul.bf16.gmra.mxu2 %v1280_v2  ;;  %vm907_vm12 = vweird.f32 %v2034_v21  ;;  %v1093_v13 = vmul.f32 %v1092_v35, %v2828_v25  ;;  %v1173_v41 = vmul.f32 %v1172_v18, %v2907_v33 }
 0x190   : > { %v904_v22 = vmul.f32 %v2034_v21, %v903_v43  ;;  %v1167_v44 = vadd.f32 0.18741608, %v1166_v46  ;;  %vm906_vm13 = vweird.f32 %v3097_v54  ;;  %vm911_vm14 = vcmp.eq.f32.partialorder %v910_v52, 8.507059e+37 }
 0x191   : > { %2035 = vrcp.f32 %v3132_v26  ;;  %v1018_v20 = vadd.f32 0.4994258, %v1017_v6  ;;  %v976_v4 = vadd.f32 0.112945676, %v975_v32  ;;  %v1055_v51 = vmul.f32 %v1054_v8, %v2807_v48  ;;  %vm908_vm15 = vmor %vm906_vm13, %vm907_vm12 }
 0x192   : > { %v905_v45 = vadd.f32 %v2034_v21, %v904_v22  ;;  %v913_v9 = vor.u32 1.1754944e-38, %v912_v40  ;;  %v1243_v15 = vadd.f32 1.0, %v1777_v63  ;;  %v1094_v62 = vadd.f32 0.014752088, %v1093_v13  ;;  %v3431_v63 = vld [vmem:[#allocation34_spill] sm:$0xff] }
 0x193   : > { %v1174_v60 = vadd.f32 0.014752088, %v1173_v41  ;;  %v1019_v14 = vmul.f32 %v1018_v20, %v2788_v61  ;;  %v977_v46 = vmul.f32 %v976_v4, %v2769_v30  ;;  %v1056_v53 = vadd.f32 0.112945676, %v1055_v51 }
 0x194   : > { %v909_v29 = vsel %vm908_vm15, %v2034_v21, %v905_v45  ;;  %v1095_v36 = vmul.f32 %v1094_v62, %v2828_v25  ;;  %v1131_v10 = vmul.f32 3.8918573e-05, %v2861_v24  ;;  %v3152_v61 = vmul.f32 %v3110_v12, %v2810_v50 }
 0x195   : > { %v914_v54 = vsel %vm911_vm14, %v913_v9, %v909_v29  ;;  %v1175_v58 = vmul.f32 %v1174_v60, %v2907_v33  ;;  %v3147_v37 = vadd.f32 1.0, %v1019_v14  ;;  %v978_v39 = vadd.f32 0.4994258, %v977_v46 }
 0x196   : > { %v915_v5 = vmul.f32 %v914_v54, %v2912_v42  ;;  %v1057_v47 = vmul.f32 %v1056_v53, %v2807_v48  ;;  %v3155_v38 = vmul.f32 %v1167_v44, %v2907_v33  ;;  %v950_v21 = vand.u32 2147483647, %v3132_v26 }
 0x197   : > { %v2036_v0 = vpop.eup %2035  ;;  %v1096_v3 = vadd.f32 0.112945676, %v1095_v36  ;;  %v1259_v34 = vmul.f32 %v1243_v15, %v3428_v28  ;;  %2037 = vrcp.f32 %v3147_v37  ;;  %v952_v2 = vand.u32 2147483648, %v3132_v26 }
 0x198   : > { %v1779_v1 = vclamps-f32 %v915_v5, 1.0  ;;  %v942_v42 = vmul.f32 %v2036_v0, %v3132_v26  ;;  %v979_v31 = vmul.f32 %v978_v39, %v2769_v30  ;;  %v1176_v52 = vadd.f32 0.112945676, %v1175_v58 }
 0x199   : > { %v1132_v50 = vadd.f32 0.001143296, %v1131_v10  ;;  %v1058_v7 = vadd.f32 0.4994258, %v1057_v47  ;;  %v1097_v27 = vmul.f32 %v1096_v3, %v2828_v25  ;;  %vm946_vm0 = vweird.f32 %v3132_v26 }
 0x19a   : > { %v1245_v12 = vadd.f32 1.0, %v1779_v1  ;;  %v943_v40 = vsub.f32 1.0, %v942_v42  ;;  %vm947_vm1 = vweird.f32 %v2036_v0  ;;  %vm3165_vm2 = vcmp.eq.f32.partialorder %v950_v21, 8.507059e+37 }
 0x19b   : > { %v3169_v55 = vadd.f32 1.0, %v979_v31  ;;  %v1059_v30 = vmul.f32 %v1058_v7, %v2807_v48  ;;  %v1098_v18 = vadd.f32 0.4994258, %v1097_v27  ;;  %v953_v6 = vor.u32 1.1754944e-38, %v952_v2  ;;  %vm948_vm3 = vmor %vm946_vm0, %vm947_vm1  ;;  %v3440_v31 = vld [vmem:[#allocation40_spill] sm:$0xff] }
 0x19c   : > { %v1261_v43 = vmul.f32 %v1245_v12, %v3431_v63  ;;  %v944_v35 = vmul.f32 %v2036_v0, %v943_v40  ;;  %v1177_v32 = vmul.f32 %v1176_v52, %v2907_v33  ;;  %v1133_v8 = vmul.f32 %v1132_v50, %v2861_v24 }
 0x19d   : > { %2039 = vrcp.f32 %v3169_v55  ;;  %v2038_v22 = vpop.eup %2037  ;;  %v3176_v44 = vadd.f32 1.0, %v1059_v30  ;;  %v1099_v45 = vmul.f32 %v1098_v18, %v2828_v25  ;;  %vm1026_vm4 = vweird.f32 %v3147_v37 }
 0x19e   : > { %v1281_v13 = vpack.c.bf16 %v1261_v43, %v1259_v34  ;;  %v945_v41 = vadd.f32 %v2036_v0, %v944_v35  ;;  %v1022_v48 = vmul.f32 %v2038_v22, %v3147_v37  ;;  %v1030_v20 = vand.u32 2147483647, %v3147_v37 }
 0x19f   : > { %v1211_v4 = vmul.f32 3.8918573e-05, %v2947_v19  ;;  %v1032_v9 = vand.u32 2147483648, %v3147_v37  ;;  %v990_v15 = vand.u32 2147483647, %v3169_v55  ;;  %2041 = vrcp.f32 %v3176_v44 }
 0x1a0   : > { %1456 = vmatmul.bf16.gmra.mxu3 %v1281_v13  ;;  %v949_v51 = vsel %vm948_vm3, %v2036_v0, %v945_v41  ;;  %v1023_v26 = vsub.f32 1.0, %v1022_v48  ;;  %v992_v62 = vand.u32 2147483648, %v3169_v55  ;;  %v3192_v60 = vadd.f32 1.0, %v1099_v45 }
 0x1a1   : > { %v954_v25 = vsel %vm3165_vm2, %v953_v6, %v949_v51  ;;  %vm1027_vm5 = vweird.f32 %v2038_v22  ;;  %v1178_v14 = vadd.f32 0.4994258, %v1177_v32  ;;  %v1134_v46 = vadd.f32 0.014752088, %v1133_v8 }
 0x1a2   : > { %v955_v29 = vmul.f32 %v954_v25, %v2919_v23  ;;  %v1024_v54 = vmul.f32 %v2038_v22, %v1023_v26  ;;  %v1070_v36 = vand.u32 2147483647, %v3176_v44  ;;  %v1072_v58 = vand.u32 2147483648, %v3176_v44  ;;  %vm1028_vm9 = vmor %vm1026_vm4, %vm1027_vm5 }
 0x1a3   : > { %v2040_v53 = vpop.eup %2039  ;;  %2043 = vrcp.f32 %v3192_v60  ;;  %vm3198_vm6 = vcmp.eq.f32.partialorder %v1030_v20, 8.507059e+37  ;;  %v1033_v5 = vor.u32 1.1754944e-38, %v1032_v9  ;;  %vm986_vm7 = vweird.f32 %v3169_v55 }
 0x1a4   : > { %v982_v39 = vmul.f32 %v2040_v53, %v3169_v55  ;;  %v1025_v23 = vadd.f32 %v2038_v22, %v1024_v54  ;;  %vm3204_vm8 = vcmp.eq.f32.partialorder %v990_v15, 8.507059e+37  ;;  %v1179_v0 = vmul.f32 %v1178_v14, %v2907_v33 }
 0x1a5   : > { %v1135_v21 = vmul.f32 %v1134_v46, %v2861_v24  ;;  %v2042_v3 = vpop.eup %2041  ;;  %v1780_v1 = vclamps-f32 %v955_v29, 1.0  ;;  %v993_v34 = vor.u32 1.1754944e-38, %v992_v62  ;;  %vm1066_vm10 = vweird.f32 %v3176_v44 }
 0x1a6   : > { %v983_v28 = vsub.f32 1.0, %v982_v39  ;;  %v1029_v42 = vsel %vm1028_vm9, %v2038_v22, %v1025_v23  ;;  %v1062_v2 = vmul.f32 %v2042_v3, %v3176_v44  ;;  %vm3215_vm11 = vcmp.eq.f32.partialorder %v1070_v36, 8.507059e+37 }
 0x1a7   : > { %v1073_v33 = vor.u32 1.1754944e-38, %v1072_v58  ;;  %v1212_v52 = vadd.f32 0.001143296, %v1211_v4  ;;  %v1034_v50 = vsel %vm3198_vm6, %v1033_v5, %v1029_v42  ;;  %vm987_vm12 = vweird.f32 %v2040_v53  ;;  %v3439_v42 = vld [vmem:[#allocation38_spill] sm:$0xff] }
 0x1a8   : > { %v984_v12 = vmul.f32 %v2040_v53, %v983_v28  ;;  %v3221_v37 = vadd.f32 1.0, %v1179_v0  ;;  %v1035_v7 = vmul.f32 %v1034_v50, %v2979_v59  ;;  %v1063_v27 = vsub.f32 1.0, %v1062_v2  ;;  %vm988_vm14 = vmor %vm986_vm7, %vm987_vm12  ;;  %v3438_v28 = vld [vmem:[#allocation36_spill] sm:$0xff] }
 0x1a9   : > { %v2044_v40 = vpop.eup %2043  ;;  %vm1106_vm13 = vweird.f32 %v3192_v60  ;;  %v1136_v49 = vadd.f32 0.112945676, %v1135_v21  ;;  %v1246_v63 = vadd.f32 1.0, %v1780_v1  ;;  %vm1067_vm15 = vweird.f32 %v2042_v3 }
 0x1aa   : > { %v985_v43 = vadd.f32 %v2040_v53, %v984_v12  ;;  %v1102_v35 = vmul.f32 %v2044_v40, %v3192_v60  ;;  %2045 = vrcp.f32 %v3221_v37  ;;  %v1782_v30 = vclamps-f32 %v1035_v7, 1.0  ;;  %vm1068_vm0 = vmor %vm1066_vm10, %vm1067_vm15 }
 0x1ab   : > { %v1064_v18 = vmul.f32 %v2042_v3, %v1063_v27  ;;  %v1213_v6 = vmul.f32 %v1212_v52, %v2947_v19  ;;  %v1110_v8 = vand.u32 2147483647, %v3192_v60  ;;  %v1137_v22 = vmul.f32 %v1136_v49, %v2861_v24  ;;  %v3441_v52 = vld [vmem:[#allocation35_spill] sm:$0xff] }
 0x1ac   : > { %v989_v32 = vsel %vm988_vm14, %v2040_v53, %v985_v43  ;;  %v1103_v59 = vsub.f32 1.0, %v1102_v35  ;;  %v1248_v13 = vadd.f32 1.0, %v1782_v30  ;;  %v1112_v48 = vand.u32 2147483648, %v3192_v60 }
 0x1ad   : > { %v994_v41 = vsel %vm3204_vm8, %v993_v34, %v989_v32  ;;  %v1065_v45 = vadd.f32 %v2042_v3, %v1064_v18  ;;  %vm1107_vm1 = vweird.f32 %v2044_v40  ;;  %v1138_v4 = vadd.f32 0.4994258, %v1137_v22 }
 0x1ae   : > { %v995_v55 = vmul.f32 %v994_v41, %v2945_v16  ;;  %v1104_v20 = vmul.f32 %v2044_v40, %v1103_v59  ;;  %v1262_v51 = vmul.f32 %v1246_v63, %v2870_v11  ;;  %v1264_v9 = vmul.f32 %v1248_v13, %v2891_v56  ;;  %vm1108_vm2 = vmor %vm1106_vm13, %vm1107_vm1  ;;  %v3442_v13 = vld [vmem:[#allocation29_spill] sm:$0xff] }
 0x1af   : > { %v1069_v15 = vsel %vm1068_vm0, %v2042_v3, %v1065_v45  ;;  %v1214_v25 = vadd.f32 0.014752088, %v1213_v6  ;;  %v1139_v16 = vmul.f32 %v1138_v4, %v2861_v24  ;;  %v1113_v53 = vor.u32 1.1754944e-38, %v1112_v48  ;;  %v3443_v45 = vld [vmem:[#allocation33_spill] sm:$0xff] }
 0x1b0   : > { %v2046_v26 = vpop.eup %2045  ;;  %v1781_v62 = vclamps-f32 %v995_v55, 1.0  ;;  %v1074_v29 = vsel %vm3215_vm11, %v1073_v33, %v1069_v15  ;;  %v1105_v14 = vadd.f32 %v2044_v40, %v1104_v20  ;;  %v1282_v46 = vpack.c.bf16 %v1264_v9, %v1262_v51 }
 0x1b1   : > { %v1075_v44 = vmul.f32 %v1074_v29, %v3107_v17  ;;  %v1182_v11 = vmul.f32 %v2046_v26, %v3221_v37  ;;  %vm1111_vm3 = vcmp.eq.f32.partialorder %v1110_v8, 8.507059e+37  ;;  %v3247_v54 = vadd.f32 1.0, %v1139_v16 }
 0x1b2   : > { %v1109_v56 = vsel %vm1108_vm2, %v2044_v40, %v1105_v14  ;;  %v1215_v36 = vmul.f32 %v1214_v25, %v2947_v19  ;;  %1432 = vmatmul.bf16.gmra.mxu2 %v1282_v46  ;;  %v1247_v10 = vadd.f32 1.0, %v1781_v62  ;;  %v1169_v23 = vadd.f32 1.1283791, %v3155_v38 }
 0x1b3   : > { %v1783_v58 = vclamps-f32 %v1075_v44, 1.0  ;;  %v1114_v5 = vsel %vm1111_vm3, %v1113_v53, %v1109_v56  ;;  %v1183_v39 = vsub.f32 1.0, %v1182_v11  ;;  %v1190_v17 = vand.u32 2147483647, %v3221_v37  ;;  %v3444_v56 = vld [vmem:[#allocation32_spill] sm:$0xff] }
 0x1b4   : > { %v1192_v60 = vand.u32 2147483648, %v3221_v37  ;;  %2047 = vrcp.f32 %v3247_v54  ;;  %v1115_v0 = vmul.f32 %v1114_v5, %v3152_v61  ;;  %vm1187_vm4 = vweird.f32 %v2046_v26 }
 0x1b5   : > { %v1249_v47 = vadd.f32 1.0, %v1783_v58  ;;  %v1184_v21 = vmul.f32 %v2046_v26, %v1183_v39  ;;  %v1204_v3 = vmul.f32 %v3116_v57, %v2947_v19  ;;  %v1216_v1 = vadd.f32 0.112945676, %v1215_v36 }
 0x1b6   : > { %v1263_v34 = vmul.f32 %v1247_v10, %v3438_v28  ;;  %vm1186_vm5 = vweird.f32 %v3221_v37  ;;  %v1126_v33 = vmul.f32 %v3440_v31, %v2861_v24  ;;  %v1170_v50 = vmul.f32 %v1169_v23, %v3441_v52 }
 0x1b7   : > { %v1265_v2 = vmul.f32 %v1249_v47, %v3439_v42  ;;  %v1185_v38 = vadd.f32 %v2046_v26, %v1184_v21  ;;  %vm1188_vm6 = vmor %vm1186_vm5, %vm1187_vm4  ;;  %v1193_v61 = vor.u32 1.1754944e-38, %v1192_v60  ;;  %v1217_v12 = vmul.f32 %v1216_v1, %v2947_v19  ;;  %v3445_v47 = vld [vmem:[#allocation39_spill] sm:$0xff]  ;;  %v3446_v42 = vld [vmem:[#allocation30_spill] sm:$0xff] }
 0x1b8   : > { %v1784_v7 = vclamps-f32 %v1115_v0, 1.0  ;;  %vm1191_vm7 = vcmp.eq.f32.partialorder %v1190_v17, 8.507059e+37  ;;  %v1205_v49 = vadd.f32 0.05243302, %v1204_v3  ;;  %v1127_v30 = vadd.f32 0.18741608, %v1126_v33 }
 0x1b9   : > { %v1283_v40 = vpack.c.bf16 %v1265_v2, %v1263_v34  ;;  %v1189_v57 = vsel %vm1188_vm6, %v2046_v26, %v1185_v38  ;;  %v1218_v43 = vadd.f32 0.4994258, %v1217_v12  ;;  %v578_v41 = vmul.f32 0.5, %v3442_v13  ;;  %v3447_v38 = vld [vmem:[#allocation37_spill] sm:$0xff] }
 0x1ba   : > { %v2048_v27 = vpop.eup %2047  ;;  %v1194_v63 = vsel %vm1191_vm7, %v1193_v61, %v1189_v57  ;;  %v1250_v32 = vadd.f32 1.0, %v1784_v7  ;;  %v1206_v8 = vmul.f32 %v1205_v49, %v2947_v19  ;;  %v580_v48 = vmul.f32 0.5, %v3443_v45 }
 0x1bb   : > { %1461 = vmatmul.bf16.gmra.mxu3 %v1283_v40  ;;  %v1195_v35 = vmul.f32 %v1194_v63, %v1170_v50  ;;  %v1142_v37 = vmul.f32 %v2048_v27, %v3247_v54  ;;  %v1219_v18 = vmul.f32 %v1218_v43, %v2947_v19  ;;  %v1128_v4 = vmul.f32 %v1127_v30, %v2861_v24  ;;  %v1270_v40 = vld [vmem:[#allocation2 + $0x30] sm:$0xff]  ;;  %v1271_v63 = vld [vmem:[#allocation2] sm:$0xff] }
 0x1bc   : > { %v1266_v51 = vmul.f32 %v1250_v32, %v578_v41  ;;  %vm1147_vm8 = vweird.f32 %v2048_v27  ;;  %v1207_v25 = vadd.f32 0.18741608, %v1206_v8  ;;  %v1152_v26 = vand.u32 2147483648, %v3247_v54 }
 0x1bd   : > { %v1786_v6 = vclamps-f32 %v1195_v35, 1.0  ;;  %v1143_v59 = vsub.f32 1.0, %v1142_v37  ;;  %v1220_v22 = vadd.f32 1.0, %v1219_v18  ;;  %vm1146_vm9 = vweird.f32 %v3247_v54  ;;  %v1272_v18 = vld [vmem:[#allocation2 + $0x18] sm:$0xff] }
 0x1be   : > { %v1150_v29 = vand.u32 2147483647, %v3247_v54  ;;  %vm1148_vm10 = vmor %vm1146_vm9, %vm1147_vm8  ;;  %v1129_v14 = vadd.f32 1.1283791, %v1128_v4  ;;  %v1208_v24 = vmul.f32 %v1207_v25, %v2947_v19  ;;  %v1153_v44 = vor.u32 1.1754944e-38, %v1152_v26 }
 0x1bf   : > { %v1252_v55 = vadd.f32 1.0, %v1786_v6  ;;  %v1144_v20 = vmul.f32 %v2048_v27, %v1143_v59  ;;  %2049 = vrcp.f32 %v1220_v22  ;;  %v1232_v5 = vand.u32 2147483648, %v1220_v22 }
 0x1c0   : > { %vm1151_vm11 = vcmp.eq.f32.partialorder %v1150_v29, 8.507059e+37  ;;  %v1130_v36 = vmul.f32 %v1129_v14, %v3444_v56  ;;  %v1209_v10 = vadd.f32 1.1283791, %v1208_v24  ;;  %v1230_v54 = vand.u32 2147483647, %v1220_v22  ;;  %v1276_v14 = vld [vmem:[#allocation2 + $0x28] sm:$0xff] }
 0x1c1   : > { %v1268_v9 = vmul.f32 %v1252_v55, %v580_v48  ;;  %v1145_v15 = vadd.f32 %v2048_v27, %v1144_v20  ;;  %vm1226_vm13 = vweird.f32 %v1220_v22  ;;  %v1233_v60 = vor.u32 1.1754944e-38, %v1232_v5  ;;  %v1274_v55 = vld [vmem:[#allocation2 + $0x8] sm:$0xff] }
 0x1c2   : > { %v1210_v0 = vmul.f32 %v1209_v10, %v3445_v47  ;;  %vm1231_vm15 = vcmp.eq.f32.partialorder %v1230_v54, 8.507059e+37  ;;  %v579_v2 = vmul.f32 0.5, %v3446_v42  ;;  %v581_v31 = vmul.f32 0.5, %v3447_v38 }
 0x1c3   : > { %v1284_v62 = vpack.c.bf16 %v1268_v9, %v1266_v51  ;;  %v1149_v16 = vsel %vm1148_vm10, %v2048_v27, %v1145_v15  ;;  %v1275_v15 = vld [vmem:[#allocation2 + $0x20] sm:$0xff] }
 0x1c4   : > { %v1154_v11 = vsel %vm1151_vm11, %v1153_v44, %v1149_v16 }
 0x1c5   : > { %1437 = vmatmul.bf16.gmra.mxu2 %v1284_v62  ;;  %v2050_v46 = vpop.eup %2049  ;;  %v1155_v39 = vmul.f32 %v1154_v11, %v1130_v36 }
 0x1c6   : > { %v1222_v53 = vmul.f32 %v2050_v46, %v1220_v22  ;;  %vm1227_vm12 = vweird.f32 %v2050_v46  ;;  %v1273_v22 = vld [vmem:[#allocation2 + $0x10] sm:$0xff] }
 0x1c7   : > { %vm1228_vm14 = vmor %vm1226_vm13, %vm1227_vm12  ;;  %v1785_v19 = vclamps-f32 %v1155_v39, 1.0 }
 0x1c8   : > { %v1223_v58 = vsub.f32 1.0, %v1222_v53  ;;  %v1277_v53 = vld [vmem:[#allocation2 + $0x38] sm:$0xff] }
 0x1c9   : > { %v1251_v34 = vadd.f32 1.0, %v1785_v19 }
 0x1ca   : > { %v1224_v23 = vmul.f32 %v2050_v46, %v1223_v58 }
 0x1cb   : > { %v1267_v52 = vmul.f32 %v1251_v34, %v579_v2 }
 0x1cc   : > { %v1225_v17 = vadd.f32 %v2050_v46, %v1224_v23 }
 0x1ce   : > { %v1229_v21 = vsel %vm1228_vm14, %v2050_v46, %v1225_v17 }
 0x1cf   : > { %v1234_v3 = vsel %vm1231_vm15, %v1233_v60, %v1229_v21 }
 0x1d0   : > { %v1235_v1 = vmul.f32 %v1234_v3, %v1210_v0 }
 0x1d2   : > { %v1787_v28 = vclamps-f32 %v1235_v1, 1.0 }
 0x1d4   : > { %v1253_v33 = vadd.f32 1.0, %v1787_v28 }
 0x1d6   : > { %v1269_v50 = vmul.f32 %v1253_v33, %v581_v31 }
 0x1d8   : > { %v1285_v61 = vpack.c.bf16 %v1269_v50, %v1267_v52 }
 0x1da   : > { %1466 = vmatmul.bf16.gmra.mxu3 %v1285_v61 }
 0x202   : > { %v1423_v12 = vpop.f32.mrf.mxu2 }
 0x208   : > { %v1452_v7 = vpop.f32.mrf.mxu3 }
 0x209   : > { %v1453_v57 = vadd.f32 %v1452_v7, %v1423_v12 }
 0x20a   : > { %v1425_v49 = vpop.f32.mrf.mxu2 }
 0x20b   : > { %v1472_v27 = vadd.f32 %v1453_v57, %v1270_v40 }
 0x20d   : > { %1480 = vst [vmem:[#allocation2 + $0x30] sm:$0xff] %v1472_v27 }
 0x210   : > { %v1454_v43 = vpop.f32.mrf.mxu3 }
 0x211   : > { %v1455_v35 = vadd.f32 %v1454_v43, %v1425_v49 }
 0x212   : > { %v1428_v30 = vpop.f32.mrf.mxu2 }
 0x213   : > { %v1473_v37 = vadd.f32 %v1455_v35, %v1271_v63 }
 0x215   : > { %1481 = vst [vmem:[#allocation2] sm:$0xff] %v1473_v37 }
 0x21a   : > { %v1430_v8 = vpop.f32.mrf.mxu2 }
 0x223   : > { %v1457_v6 = vpop.f32.mrf.mxu3 }
 0x224   : > { %v1458_v32 = vadd.f32 %v1457_v6, %v1428_v30 }
 0x226   : > { %v1474_v59 = vadd.f32 %v1458_v32, %v1272_v18 }
 0x228   : > { %1482 = vst [vmem:[#allocation2 + $0x18] sm:$0xff] %v1474_v59 }
 0x22b   : > { %v1459_v13 = vpop.f32.mrf.mxu3 }
 0x22c   : > { %v1460_v41 = vadd.f32 %v1459_v13, %v1430_v8 }
 0x22e   : > { %v1475_v45 = vadd.f32 %v1460_v41, %v1273_v22 }
 0x230   : > { %1483 = vst [vmem:[#allocation2 + $0x10] sm:$0xff] %v1475_v45 }
 0x235   : > { %v1433_v48 = vpop.f32.mrf.mxu2 }
 0x23d   : > { %v1435_v9 = vpop.f32.mrf.mxu2 }
 0x23e   : > { %v1462_v20 = vpop.f32.mrf.mxu3 }
 0x23f   : > { %v1463_v4 = vadd.f32 %v1462_v20, %v1433_v48 }
 0x241   : > { %v1476_v51 = vadd.f32 %v1463_v4, %v1274_v55 }
 0x243   : > { %1484 = vst [vmem:[#allocation2 + $0x8] sm:$0xff] %v1476_v51 }
 0x246   : > { %v1464_v25 = vpop.f32.mrf.mxu3 }
 0x247   : > { %v1465_v26 = vadd.f32 %v1464_v25, %v1435_v9 }
 0x248   : > { %v1438_v29 = vpop.f32.mrf.mxu2 }
 0x249   : > { %v1477_v62 = vadd.f32 %v1465_v26, %v1275_v15 }
 0x24b   : > { %1485 = vst [vmem:[#allocation2 + $0x20] sm:$0xff] %v1477_v62 }
 0x250   : > { %v1440_v44 = vpop.f32.mrf.mxu2 }
 0x25d   : > { %v1467_v16 = vpop.f32.mrf.mxu3 }
 0x25e   : > { %v1468_v46 = vadd.f32 %v1467_v16, %v1438_v29 }
 0x260   : > { %v1478_v24 = vadd.f32 %v1468_v46, %v1276_v14 }
 0x262   : > { %1486 = vst [vmem:[#allocation2 + $0x28] sm:$0xff] %v1478_v24 }
 0x265   : > { %v1469_v11 = vpop.f32.mrf.mxu3 }
 0x266   : > { %v1470_v56 = vadd.f32 %v1469_v11, %v1440_v44  ;;  %1491 = sbr.rel (%p1852_p8) target bundleno = 630 (0x276), region = 64 }
 0x268   : > { %v1479_v36 = vadd.f32 %v1470_v56, %v1277_v53 }
 0x26a   : > { %1487 = vst [vmem:[#allocation2 + $0x38] sm:$0xff] %v1479_v36 }
 0x26b   : > { %v1492_v58 = vld [vmem:[#allocation2 + $0x30] sm:$0xff]  ;;  %v2051_v10 = vld [vmem:[%s3449_s11] ss:$0 sm:$0xff]  ;;  %v1494_v39 = vld [vmem:[#allocation2 + $0x18] sm:$0xff] }
 0x26c   : > { %v1493_v5 = vld [vmem:[#allocation2] sm:$0xff]  ;;  %v1495_v23 = vld [vmem:[#allocation2 + $0x10] sm:$0xff]  ;;  %v1504_v54 = vadd.f32 %v2051_v10, %v1492_v58  ;;  %v1506_v60 = vadd.f32 %v2051_v10, %v1494_v39  ;;  %v1496_v47 = vld [vmem:[#allocation2 + $0x8] sm:$0xff] }
 0x26d   : > { %v1505_v17 = vadd.f32 %v2051_v10, %v1493_v5  ;;  %v1497_v0 = vld [vmem:[#allocation2 + $0x20] sm:$0xff]  ;;  %v1507_v19 = vadd.f32 %v2051_v10, %v1495_v23  ;;  %v1498_v21 = vld [vmem:[#allocation2 + $0x28] sm:$0xff]  ;;  %v1508_v3 = vadd.f32 %v2051_v10, %v1496_v47 }
 0x26e   : > { %1512 = vst [vmem:[%s2561_s30] sm:$0xff] %v1504_v54  ;;  %v1509_v28 = vadd.f32 %v2051_v10, %v1497_v0  ;;  %v1510_v34 = vadd.f32 %v2051_v10, %v1498_v21 }
 0x26f   : > { %1513 = vst [vmem:[%s2561_s30 + $0x8] sm:$0xff] %v1505_v17 }
 0x270   : > { %1514 = vst [vmem:[%s2561_s30 + $0x10] sm:$0xff] %v1506_v60 }
 0x271   : > { %v1499_v1 = vld [vmem:[#allocation2 + $0x38] sm:$0xff]  ;;  %1515 = vst [vmem:[%s2561_s30 + $0x18] sm:$0xff] %v1507_v19 }
 0x272   : > { %v1511_v42 = vadd.f32 %v2051_v10, %v1499_v1  ;;  %1516 = vst [vmem:[%s2561_s30 + $0x20] sm:$0xff] %v1508_v3 }
 0x273   : > { %1517 = vst [vmem:[%s2561_s30 + $0x28] sm:$0xff] %v1509_v28 }
 0x274   : > { %1518 = vst [vmem:[%s2561_s30 + $0x30] sm:$0xff] %v1510_v34 }
 0x275   : > { %1519 = vst [vmem:[%s2561_s30 + $0x38] sm:$0xff] %v1511_v42 }
 0x276 PF: > { %s3450_s12 = sld [smem:[#allocation20_spill]]  ;;  %s1533_s4 = sshll.u32 %s2561_s30, 4  ;;  %s1534_s4 = int_to_ptr.vmem [resolvable:$true] %s1533_s4 }
 0x277   : > { %s3452_s23 = sld [smem:[#allocation44_spill]]  ;;  %s1521_s28 = scalar_lea.sflag [#allocation5], %s2535_s16 }
 0x27c   : > { %s1893_s21 = sshll.u32 %s3450_s12, 6 }
 0x27d   : > { %s3453_s8 = smov %s3452_s23  ;;  %s1532_s0 = scalar_lea.hbm %s3452_s23, %s1893_s21 }
 0x27e   : > { %s1535_s24 = sshll.u32 %s1532_s0, 4  ;;  %s2192_s29 = scalar_lea.hbm %s3453_s8, 128  ;;  %s1536_s24 = int_to_ptr.hbm [resolvable:$true] %s1535_s24 }
 0x27f   : > { %s2186_s6 = sshra.s32 %s1536_s24, 4  ;;  %s2187_s6 = int_to_ptr.hbm [resolvable:$true] %s2186_s6 }
 0x280   : > { %s2188_s15 = scalar_lea.hbm %s2187_s6, 64  ;;  %p2193_p4 = scmp.lt.s32.totalorder %s2187_s6, %s3453_s8 }
 0x281   : > { %p2189_p11 = scmp.ne.s32.totalorder %s2187_s6, %s2188_s15  ;;  %p2194_p6 = scmp.lt.s32.totalorder %s2192_s29, %s2188_s15 }
 0x283   : > { %p2190_p12 = pnand %p2189_p11, %p2493_p1  ;;  %p2195_p0 = por %p2194_p6, %p2193_p4 }
 0x285   : > { %p2191_p13 = pneg %p2190_p12 }
 0x287   : > { %p2196_p7 = pnand %p2195_p0, %p2191_p13 }
 0x289   : > { %2199 = shalt.err (!%p2196_p7)
}
 0x28a   : > { %s2310_s16 = smov 128   ;;  %s2311_s7 = smov 8  }
 0x28b   : > { %1902 = dma.vmem_to_hbm [thread:$0]  (%p2493_p1), %s1534_s4, 1024, %s1536_s24, %s1521_s28, %s2310_s16, %s2310_s16, %s2311_s7  }
 0x28c PF: > { %s3454_s30 = sld [smem:[#allocation22_spill]] }
 0x28d   : > { %s3455_s9 = sld [smem:[#allocation17_spill]] }
 0x292   : > { %p1922_p9 = scmp.ge.s32.totalorder %s3454_s30, 2 }
 0x293   : > { %s1550_s1 = sand.u32 1, %s3455_s9  }
 0x294   : > { %p1918_p3 = pnand %p1922_p9, %p2500_p2  ;;  %s1551_s25 = scalar_lea.sflag [#allocation5], %s1550_s1 }
 0x296   : > { %p1919_p10 = pneg %p1918_p3 }
 0x298   : > { %2257 = dma.done.wait (%p1919_p10), %s1551_s25, 1024  }
 0x299   : > { %2259 = vsyncadd (%p1919_p10), %s1551_s25, 4294966272  ;;  %s27_s28 = sadd.s32 1, %s3454_s30   ;;  %s3457_s11 = sld [smem:[#allocation16_spill]] }
 0x29a   : > { %p24_p5 = scmp.ge.s32.totalorder %s27_s28, 6   ;;  %s3458_s20 = sld [smem:[#allocation25_spill]] }
 0x29b   : > { %s3459_s12 = sld [smem:[#allocation18_spill]]  ;;  %s3464_s18 = smov %s2266_s19 }
 0x29c   : > { %s3460_s23 = sld [smem:[#allocation26_spill]]  ;;  %s3466_s21 = smov %s2278_s22 }
 0x29d   : > { %s3461_s25 = sld [smem:[#allocation21_spill]]  ;;  %s3468_s24 = smov %s2294_s26 }
 0x29e   : > { %s3462_s14 = sld [smem:[#allocation23_spill]] }
 0x29f   : > { %s3463_s27 = sld [smem:[#allocation24_spill]]  ;;  %s3465_s19 = smov %s3457_s11 }
 0x2a0   :  { %26 = sbr.rel (!%p24_p5) target bundleno = 18 (0x12), region = 130 }
 0x2a1   : > { %s3467_s22 = smov %s3459_s12 }
 0x2a4   : > { %s3469_s26 = smov %s3462_s14 }
 0x2a5   :  { %1557 = vsyncpa [#allocation4], 1 }
 0x2a6   :  { %1559 = vsyncpa [#allocation4 + $0x1], 1 }
 0x2a7   :  { %1560 = vsyncpa [#allocation7], 1 }
 0x2a8   :  { %1562 = vsyncpa [#allocation7 + $0x1], 1 }
 0x2a9   :  { %1563 = vsyncpa [#allocation10], 1 }
 0x2aa   :  { %1565 = vsyncpa [#allocation10 + $0x1], 1 }
 0x2ab   :  { %1566 = vsyncpa [#allocation5], 1 }
 0x2ac   :  { %1568 = vsyncpa [#allocation5 + $0x1], 1 }

</bundles_post_ra>
